<compile_context>
chip_gen: v7x
topology: tpu7x:2x2x1
jax: 0.10.0
libtpu: 0.0.40
codegen_flags: <defaults>
</compile_context>

<pallas_src>
import functools

import jax
import jax.numpy as jnp
from jax import lax
from jax.experimental import pallas as pl
from jax.experimental.pallas import tpu as pltpu

KSIZE = 7
PAD = 3


def _round_up(v, m):
    return -(-v // m) * m


def _sam_kernel(masks_ref, wv_ref, x_ref, o_ref, packed_ref, *, W):
    # masks_ref : VMEM (7, HWp) f32   per-dj column-validity masks.
    # wv_ref    : VMEM (49, 2*Gb, 1) f32 per-tap sublane weight columns
    #             (rows [0:Gb) carry the mean-channel weight, [Gb:2Gb) the max).
    # x_ref     : VMEM (Gb, C, HWp)  input block (lane-dense flattened spatial).
    # o_ref     : VMEM (Gb, C, HWp)  output block.
    # packed_ref: VMEM (2*Gb, L) f32 vertically zero-padded flat mean/max maps,
    #             mean rows on sublanes [0:Gb), max rows on [Gb:2Gb).
    Gb, C, HWp = x_ref.shape
    L = packed_ref.shape[1]
    PW = PAD * W + PAD + 1                    # covers every di*W + dj offset

    # Channel-wise mean and max in the lane-dense layout (sublane reduction).
    x = x_ref[...]                                              # (Gb, C, HWp)
    x_mean = (jnp.sum(x, axis=1) * (1.0 / C)).astype(jnp.float32)
    x_max = jnp.max(x, axis=1).astype(jnp.float32)

    # Refresh only the thin zero-pad strips (re-done every step so the kernel
    # stays correct when the "parallel" batch axis is sharded across cores),
    # then write the mean/max interiors onto adjacent sublane halves.
    packed_ref[:, :PW] = jnp.zeros((2 * Gb, PW), jnp.float32)
    packed_ref[:, PW + HWp:] = jnp.zeros((2 * Gb, L - PW - HWp), jnp.float32)
    packed_ref[:Gb, PW:PW + HWp] = x_mean
    packed_ref[Gb:, PW:PW + HWp] = x_max

    packed = packed_ref[...]                                    # (2*Gb, L)
    masks = masks_ref[...]                                      # (7, HWp)

    # 7x7 conv (2 in-ch -> 1 out-ch, no bias).  Mean and max live on adjacent
    # sublane halves of `packed`, so every (di,dj) tap costs ONE lane-shifted
    # slice + one sublane-broadcast weighted multiply (49 shifts, not 98).
    # Seven independent per-dj accumulator chains; the per-dj column mask
    # kills taps that would cross a row boundary in the flattened layout.
    conv = None
    for dj in range(-PAD, PAD + 1):
        kj = dj + PAD
        acc = None
        for di in range(-PAD, PAD + 1):
            ki = di + PAD
            s = PW + di * W + dj
            term = wv_ref[ki * KSIZE + kj] * packed[:, s:s + HWp]
            acc = term if acc is None else acc + term
        # Fold the mean/max sublane halves, then mask row-crossing columns.
        acc = (acc[:Gb, :] + acc[Gb:, :]) * masks[kj:kj + 1, :]
        conv = acc if conv is None else conv + acc

    attn = jax.nn.sigmoid(conv).astype(x.dtype)                 # (Gb, HWp)
    o_ref[...] = (x * attn[:, None, :]).astype(o_ref.dtype)


def spatial_attention_module(x, conv_weight, *,
                             max_block_bytes=6 << 20,
                             vmem_limit_bytes=48 << 20):
    """x: (B, C, H, W); conv_weight: (1, 2, 7, 7) (PyTorch OIHW).  Returns (B, C, H, W)."""
    B, C, H, W = x.shape
    HW = H * W
    HWp = _round_up(HW, 128)                  # lane-dense (unmasked vst) writeback
    PW = PAD * W + PAD + 1                    # 3*W + 4
    L = _round_up(HWp + 2 * PW, 128)          # padded flat conv-scratch length
    itemsize = jnp.dtype(x.dtype).itemsize

    # Lane-dense view of the heavy tensor; pad the spatial tail to a multiple
    # of 128 lanes only when needed (zero-padded pixels give zero mean/max,
    # exactly what the conv's vertical zero padding requires).
    # TODO(synk): for HW % 128 != 0 this costs one extra XLA pad pass over x;
    # an in-kernel lane mask would avoid that copy.
    x_flat = x.reshape(B, C, HW)
    if HWp != HW:
        x_flat = jnp.pad(x_flat, ((0, 0), (0, 0), (0, HWp - HW)))

    # Column masks: masks[dj+3, p] = 1 iff p is a real pixel and column
    # (p mod W) + dj stays inside the row.
    col = jnp.arange(HWp, dtype=jnp.int32) % W
    real = jnp.arange(HWp, dtype=jnp.int32) < HW
    masks = jnp.stack(
        [((col + dj) >= 0) & ((col + dj) < W) & real
         for dj in range(-PAD, PAD + 1)], axis=0).astype(jnp.float32)

    # ---- batch-group size from an explicit VMEM footprint model ----------
    per_block_in = C * HWp * itemsize          # input bytes per batch row
    per_gb_vmem = (4 * per_block_in            # double-buffered in + out blocks
                   + 8 * L                     # 2 f32 scratch rows per batch row
                   + 2 * 49 * 2 * 128 * 4)     # per-tap weight columns (dbl-buf)
    fixed_vmem = 2 * 8 * HWp * 4 + 2 * 49 * 8 * 128 * 4 + (1 << 20)
    budget = int(0.75 * vmem_limit_bytes)      # leave headroom under the limit
    gb_by_blk = max(1, max_block_bytes // per_block_in)
    gb_by_vmem = max(1, (budget - fixed_vmem) // per_gb_vmem)
    gb_hi = B if B < 2 else -(-B // 2)         # guarantee >= 2 grid steps (v7x)
    gb = int(max(1, min(gb_hi, gb_by_blk, gb_by_vmem)))
    if gb >= 8:
        gb -= gb % 8                           # fill all 8 sublanes in the conv
    nsteps = pl.cdiv(B, gb)                    # ragged last block is fine

    # Per-tap sublane weight columns: rows [0:gb) mean weight, [gb:2gb) max.
    w2 = conv_weight.reshape(2, KSIZE * KSIZE).astype(jnp.float32)   # (2, 49)
    wv = jnp.repeat(w2.T[:, :, None], gb, axis=1)                    # (49, 2gb, 1)

    cost = pl.CostEstimate(
        flops=int(B * HWp * (3 * C + 4 * KSIZE * KSIZE)),
        transcendentals=int(B * HWp),
        bytes_accessed=int(2 * B * C * HWp * itemsize))

    kernel = functools.partial(_sam_kernel, W=W)
    out_flat = pl.pallas_call(
        kernel,
        out_shape=jax.ShapeDtypeStruct((B, C, HWp), x.dtype),
        grid_spec=pltpu.PrefetchScalarGridSpec(
            num_scalar_prefetch=0,
            grid=(nsteps,),
            in_specs=[
                pl.BlockSpec((2 * PAD + 1, HWp), lambda b: (0, 0)),            # masks
                pl.BlockSpec((KSIZE * KSIZE, 2 * gb, 1), lambda b: (0, 0, 0)),  # weights
                pl.BlockSpec((gb, C, HWp), lambda b: (b, 0, 0)),               # x block
            ],
            out_specs=pl.BlockSpec((gb, C, HWp), lambda b: (b, 0, 0)),
            scratch_shapes=[
                pltpu.VMEM((2 * gb, L), jnp.float32),     # packed mean/max maps
            ],
        ),
        compiler_params=pltpu.CompilerParams(
            dimension_semantics=("parallel",),
            vmem_limit_bytes=vmem_limit_bytes),
        cost_estimate=cost,
    )(masks, wv, x_flat)

    if HWp != HW:
        out_flat = out_flat[:, :, :HW]
    return out_flat.reshape(B, C, H, W)


def _reference(x, conv_weight):
    """Pure-JAX reference matching the PyTorch forward."""
    x1 = jnp.mean(x, axis=1, keepdims=True)
    x2 = jnp.max(x, axis=1, keepdims=True)
    feats = jnp.concatenate([x1, x2], axis=1)                 # (B, 2, H, W)
    conv = lax.conv_general_dilated(
        feats, conv_weight,
        window_strides=(1, 1),
        padding=((PAD, PAD), (PAD, PAD)),
        dimension_numbers=("NCHW", "OIHW", "NCHW"))
    return x * jax.nn.sigmoid(conv)


if __name__ == "__main__":
    key = jax.random.PRNGKey(0)
    kx, kw = jax.random.split(key)

    B, C, H, W = 2, 4, 16, 16
    x = jax.random.normal(kx, (B, C, H, W), dtype=jnp.float32)
    # Deterministic "kaiming-ish" init for the 7x7, 2->1 conv weight (no bias).
    fan_in = 2 * KSIZE * KSIZE
    conv_weight = jax.random.uniform(
        kw, (1, 2, KSIZE, KSIZE), jnp.float32,
        minval=-(1.0 / fan_in) ** 0.5, maxval=(1.0 / fan_in) ** 0.5)

    out = spatial_attention_module(x, conv_weight)
    out = jax.block_until_ready(out)

    ref = _reference(x, conv_weight)
    assert out.shape == ref.shape and out.dtype == ref.dtype
    assert jnp.allclose(out, ref, atol=1e-5, rtol=1e-5), "mismatch vs reference"

    print("KERNEL_OK")
</pallas_src>

<mosaic_0001>
module attributes {stable_mosaic.version = 11 : i64} {
  func.func @_sam_kernel(%arg0: i32, %arg1: memref<7x256xf32, #tpu.memory_space<vmem>>, %arg2: memref<49x2x1xf32, #tpu.memory_space<vmem>>, %arg3: memref<1x4x256xf32, #tpu.memory_space<vmem>>, %arg4: memref<1x4x256xf32, #tpu.memory_space<vmem>>, %arg5: memref<2x384xf32, #tpu.memory_space<vmem>>) attributes {dimension_semantics = [#tpu.dimension_semantics<parallel>], iteration_bounds = array<i64: 2>, scalar_prefetch = 0 : i64, scratch_operands = 1 : i64, tpu.core_type = #tpu.core_type<tc>, window_params = [{pipeline_mode = #tpu.pipeline_mode<synchronous>, transform_indices = @transform_0, window_bounds = array<i64: 7, 256>}, {pipeline_mode = #tpu.pipeline_mode<synchronous>, transform_indices = @transform_1, window_bounds = array<i64: 49, 2, 1>}, {transform_indices = @transform_2, window_bounds = array<i64: 1, 4, 256>}, {transform_indices = @transform_3, window_bounds = array<i64: 1, 4, 256>}]} {
    %c0 = arith.constant 0 : index
    %c0_0 = arith.constant 0 : index
    %c0_1 = arith.constant 0 : index
    %0 = vector.load %arg3[%c0, %c0_0, %c0_1] : memref<1x4x256xf32, #tpu.memory_space<vmem>>, vector<1x4x256xf32>
    %cst = arith.constant dense<0.000000e+00> : vector<1x256xf32>
    %1 = vector.multi_reduction <add>, %0, %cst [1] : vector<1x4x256xf32> to vector<1x256xf32>
    %cst_2 = arith.constant 2.500000e-01 : f32
    %2 = vector.broadcast %cst_2 : f32 to vector<1x256xf32>
    %3 = arith.mulf %1, %2 : vector<1x256xf32>
    %cst_3 = arith.constant dense<0xFF800000> : vector<1x256xf32>
    %4 = vector.multi_reduction <maximumf>, %0, %cst_3 [1] : vector<1x4x256xf32> to vector<1x256xf32>
    %cst_4 = arith.constant 0.000000e+00 : f32
    %5 = vector.broadcast %cst_4 : f32 to vector<2x52xf32>
    %c0_5 = arith.constant 0 : index
    %c0_6 = arith.constant 0 : index
    %6 = vector.load %arg5[%c0_5, %c0_6] : memref<2x384xf32, #tpu.memory_space<vmem>>, vector<2x52xf32>
    tpu.vector_store %arg5[%c0_5, %c0_6], %5 {strides = array<i32>} : memref<2x384xf32, #tpu.memory_space<vmem>>, vector<2x52xf32>,
    %cst_7 = arith.constant 0.000000e+00 : f32
    %7 = vector.broadcast %cst_7 : f32 to vector<2x76xf32>
    %c0_8 = arith.constant 0 : index
    %c308 = arith.constant 308 : index
    %8 = vector.load %arg5[%c0_8, %c308] : memref<2x384xf32, #tpu.memory_space<vmem>>, vector<2x76xf32>
    tpu.vector_store %arg5[%c0_8, %c308], %7 {strides = array<i32>} : memref<2x384xf32, #tpu.memory_space<vmem>>, vector<2x76xf32>,
    %c0_9 = arith.constant 0 : index
    %c52 = arith.constant 52 : index
    %9 = vector.load %arg5[%c0_9, %c52] : memref<2x384xf32, #tpu.memory_space<vmem>>, vector<1x256xf32>
    tpu.vector_store %arg5[%c0_9, %c52], %3 {strides = array<i32>} : memref<2x384xf32, #tpu.memory_space<vmem>>, vector<1x256xf32>,
    %c1 = arith.constant 1 : index
    %c52_10 = arith.constant 52 : index
    %10 = vector.load %arg5[%c1, %c52_10] : memref<2x384xf32, #tpu.memory_space<vmem>>, vector<1x256xf32>
    tpu.vector_store %arg5[%c1, %c52_10], %4 {strides = array<i32>} : memref<2x384xf32, #tpu.memory_space<vmem>>, vector<1x256xf32>,
    %c0_11 = arith.constant 0 : index
    %c0_12 = arith.constant 0 : index
    %11 = vector.load %arg5[%c0_11, %c0_12] : memref<2x384xf32, #tpu.memory_space<vmem>>, vector<2x384xf32>
    %c0_13 = arith.constant 0 : index
    %c0_14 = arith.constant 0 : index
    %12 = vector.load %arg1[%c0_13, %c0_14] : memref<7x256xf32, #tpu.memory_space<vmem>>, vector<7x256xf32>
    %c0_15 = arith.constant 0 : index
    %c0_16 = arith.constant 0 : index
    %c0_17 = arith.constant 0 : index
    %13 = vector.load %arg2[%c0_15, %c0_16, %c0_17] : memref<49x2x1xf32, #tpu.memory_space<vmem>>, vector<1x2x1xf32>
    %14 = vector.shape_cast %13 : vector<1x2x1xf32> to vector<2x1xf32>
    %15 = vector.extract_strided_slice %11 {offsets = [0, 1], sizes = [2, 256], strides = [1, 1]} : vector<2x384xf32> to vector<2x256xf32>
    %16 = vector.broadcast %14 : vector<2x1xf32> to vector<2x256xf32>
    %17 = arith.mulf %16, %15 : vector<2x256xf32>
    %c7 = arith.constant 7 : index
    %c0_18 = arith.constant 0 : index
    %c0_19 = arith.constant 0 : index
    %18 = vector.load %arg2[%c7, %c0_18, %c0_19] : memref<49x2x1xf32, #tpu.memory_space<vmem>>, vector<1x2x1xf32>
    %19 = vector.shape_cast %18 : vector<1x2x1xf32> to vector<2x1xf32>
    %20 = vector.extract_strided_slice %11 {offsets = [0, 17], sizes = [2, 256], strides = [1, 1]} : vector<2x384xf32> to vector<2x256xf32>
    %21 = vector.broadcast %19 : vector<2x1xf32> to vector<2x256xf32>
    %22 = arith.mulf %21, %20 : vector<2x256xf32>
    %23 = arith.addf %17, %22 : vector<2x256xf32>
    %c14 = arith.constant 14 : index
    %c0_20 = arith.constant 0 : index
    %c0_21 = arith.constant 0 : index
    %24 = vector.load %arg2[%c14, %c0_20, %c0_21] : memref<49x2x1xf32, #tpu.memory_space<vmem>>, vector<1x2x1xf32>
    %25 = vector.shape_cast %24 : vector<1x2x1xf32> to vector<2x1xf32>
    %26 = vector.extract_strided_slice %11 {offsets = [0, 33], sizes = [2, 256], strides = [1, 1]} : vector<2x384xf32> to vector<2x256xf32>
    %27 = vector.broadcast %25 : vector<2x1xf32> to vector<2x256xf32>
    %28 = arith.mulf %27, %26 : vector<2x256xf32>
    %29 = arith.addf %23, %28 : vector<2x256xf32>
    %c21 = arith.constant 21 : index
    %c0_22 = arith.constant 0 : index
    %c0_23 = arith.constant 0 : index
    %30 = vector.load %arg2[%c21, %c0_22, %c0_23] : memref<49x2x1xf32, #tpu.memory_space<vmem>>, vector<1x2x1xf32>
    %31 = vector.shape_cast %30 : vector<1x2x1xf32> to vector<2x1xf32>
    %32 = vector.extract_strided_slice %11 {offsets = [0, 49], sizes = [2, 256], strides = [1, 1]} : vector<2x384xf32> to vector<2x256xf32>
    %33 = vector.broadcast %31 : vector<2x1xf32> to vector<2x256xf32>
    %34 = arith.mulf %33, %32 : vector<2x256xf32>
    %35 = arith.addf %29, %34 : vector<2x256xf32>
    %c28 = arith.constant 28 : index
    %c0_24 = arith.constant 0 : index
    %c0_25 = arith.constant 0 : index
    %36 = vector.load %arg2[%c28, %c0_24, %c0_25] : memref<49x2x1xf32, #tpu.memory_space<vmem>>, vector<1x2x1xf32>
    %37 = vector.shape_cast %36 : vector<1x2x1xf32> to vector<2x1xf32>
    %38 = vector.extract_strided_slice %11 {offsets = [0, 65], sizes = [2, 256], strides = [1, 1]} : vector<2x384xf32> to vector<2x256xf32>
    %39 = vector.broadcast %37 : vector<2x1xf32> to vector<2x256xf32>
    %40 = arith.mulf %39, %38 : vector<2x256xf32>
    %41 = arith.addf %35, %40 : vector<2x256xf32>
    %c35 = arith.constant 35 : index
    %c0_26 = arith.constant 0 : index
    %c0_27 = arith.constant 0 : index
    %42 = vector.load %arg2[%c35, %c0_26, %c0_27] : memref<49x2x1xf32, #tpu.memory_space<vmem>>, vector<1x2x1xf32>
    %43 = vector.shape_cast %42 : vector<1x2x1xf32> to vector<2x1xf32>
    %44 = vector.extract_strided_slice %11 {offsets = [0, 81], sizes = [2, 256], strides = [1, 1]} : vector<2x384xf32> to vector<2x256xf32>
    %45 = vector.broadcast %43 : vector<2x1xf32> to vector<2x256xf32>
    %46 = arith.mulf %45, %44 : vector<2x256xf32>
    %47 = arith.addf %41, %46 : vector<2x256xf32>
    %c42 = arith.constant 42 : index
    %c0_28 = arith.constant 0 : index
    %c0_29 = arith.constant 0 : index
    %48 = vector.load %arg2[%c42, %c0_28, %c0_29] : memref<49x2x1xf32, #tpu.memory_space<vmem>>, vector<1x2x1xf32>
    %49 = vector.shape_cast %48 : vector<1x2x1xf32> to vector<2x1xf32>
    %50 = vector.extract_strided_slice %11 {offsets = [0, 97], sizes = [2, 256], strides = [1, 1]} : vector<2x384xf32> to vector<2x256xf32>
    %51 = vector.broadcast %49 : vector<2x1xf32> to vector<2x256xf32>
    %52 = arith.mulf %51, %50 : vector<2x256xf32>
    %53 = arith.addf %47, %52 : vector<2x256xf32>
    %54 = vector.extract_strided_slice %53 {offsets = [0, 0], sizes = [1, 256], strides = [1, 1]} : vector<2x256xf32> to vector<1x256xf32>
    %55 = vector.extract_strided_slice %53 {offsets = [1, 0], sizes = [1, 256], strides = [1, 1]} : vector<2x256xf32> to vector<1x256xf32>
    %56 = arith.addf %54, %55 : vector<1x256xf32>
    %57 = vector.extract_strided_slice %12 {offsets = [0, 0], sizes = [1, 256], strides = [1, 1]} : vector<7x256xf32> to vector<1x256xf32>
    %58 = arith.mulf %56, %57 : vector<1x256xf32>
    %c1_30 = arith.constant 1 : index
    %c0_31 = arith.constant 0 : index
    %c0_32 = arith.constant 0 : index
    %59 = vector.load %arg2[%c1_30, %c0_31, %c0_32] : memref<49x2x1xf32, #tpu.memory_space<vmem>>, vector<1x2x1xf32>
    %60 = vector.shape_cast %59 : vector<1x2x1xf32> to vector<2x1xf32>
    %61 = vector.extract_strided_slice %11 {offsets = [0, 2], sizes = [2, 256], strides = [1, 1]} : vector<2x384xf32> to vector<2x256xf32>
    %62 = vector.broadcast %60 : vector<2x1xf32> to vector<2x256xf32>
    %63 = arith.mulf %62, %61 : vector<2x256xf32>
    %c8 = arith.constant 8 : index
    %c0_33 = arith.constant 0 : index
    %c0_34 = arith.constant 0 : index
    %64 = vector.load %arg2[%c8, %c0_33, %c0_34] : memref<49x2x1xf32, #tpu.memory_space<vmem>>, vector<1x2x1xf32>
    %65 = vector.shape_cast %64 : vector<1x2x1xf32> to vector<2x1xf32>
    %66 = vector.extract_strided_slice %11 {offsets = [0, 18], sizes = [2, 256], strides = [1, 1]} : vector<2x384xf32> to vector<2x256xf32>
    %67 = vector.broadcast %65 : vector<2x1xf32> to vector<2x256xf32>
    %68 = arith.mulf %67, %66 : vector<2x256xf32>
    %69 = arith.addf %63, %68 : vector<2x256xf32>
    %c15 = arith.constant 15 : index
    %c0_35 = arith.constant 0 : index
    %c0_36 = arith.constant 0 : index
    %70 = vector.load %arg2[%c15, %c0_35, %c0_36] : memref<49x2x1xf32, #tpu.memory_space<vmem>>, vector<1x2x1xf32>
    %71 = vector.shape_cast %70 : vector<1x2x1xf32> to vector<2x1xf32>
    %72 = vector.extract_strided_slice %11 {offsets = [0, 34], sizes = [2, 256], strides = [1, 1]} : vector<2x384xf32> to vector<2x256xf32>
    %73 = vector.broadcast %71 : vector<2x1xf32> to vector<2x256xf32>
    %74 = arith.mulf %73, %72 : vector<2x256xf32>
    %75 = arith.addf %69, %74 : vector<2x256xf32>
    %c22 = arith.constant 22 : index
    %c0_37 = arith.constant 0 : index
    %c0_38 = arith.constant 0 : index
    %76 = vector.load %arg2[%c22, %c0_37, %c0_38] : memref<49x2x1xf32, #tpu.memory_space<vmem>>, vector<1x2x1xf32>
    %77 = vector.shape_cast %76 : vector<1x2x1xf32> to vector<2x1xf32>
    %78 = vector.extract_strided_slice %11 {offsets = [0, 50], sizes = [2, 256], strides = [1, 1]} : vector<2x384xf32> to vector<2x256xf32>
    %79 = vector.broadcast %77 : vector<2x1xf32> to vector<2x256xf32>
    %80 = arith.mulf %79, %78 : vector<2x256xf32>
    %81 = arith.addf %75, %80 : vector<2x256xf32>
    %c29 = arith.constant 29 : index
    %c0_39 = arith.constant 0 : index
    %c0_40 = arith.constant 0 : index
    %82 = vector.load %arg2[%c29, %c0_39, %c0_40] : memref<49x2x1xf32, #tpu.memory_space<vmem>>, vector<1x2x1xf32>
    %83 = vector.shape_cast %82 : vector<1x2x1xf32> to vector<2x1xf32>
    %84 = vector.extract_strided_slice %11 {offsets = [0, 66], sizes = [2, 256], strides = [1, 1]} : vector<2x384xf32> to vector<2x256xf32>
    %85 = vector.broadcast %83 : vector<2x1xf32> to vector<2x256xf32>
    %86 = arith.mulf %85, %84 : vector<2x256xf32>
    %87 = arith.addf %81, %86 : vector<2x256xf32>
    %c36 = arith.constant 36 : index
    %c0_41 = arith.constant 0 : index
    %c0_42 = arith.constant 0 : index
    %88 = vector.load %arg2[%c36, %c0_41, %c0_42] : memref<49x2x1xf32, #tpu.memory_space<vmem>>, vector<1x2x1xf32>
    %89 = vector.shape_cast %88 : vector<1x2x1xf32> to vector<2x1xf32>
    %90 = vector.extract_strided_slice %11 {offsets = [0, 82], sizes = [2, 256], strides = [1, 1]} : vector<2x384xf32> to vector<2x256xf32>
    %91 = vector.broadcast %89 : vector<2x1xf32> to vector<2x256xf32>
    %92 = arith.mulf %91, %90 : vector<2x256xf32>
    %93 = arith.addf %87, %92 : vector<2x256xf32>
    %c43 = arith.constant 43 : index
    %c0_43 = arith.constant 0 : index
    %c0_44 = arith.constant 0 : index
    %94 = vector.load %arg2[%c43, %c0_43, %c0_44] : memref<49x2x1xf32, #tpu.memory_space<vmem>>, vector<1x2x1xf32>
    %95 = vector.shape_cast %94 : vector<1x2x1xf32> to vector<2x1xf32>
    %96 = vector.extract_strided_slice %11 {offsets = [0, 98], sizes = [2, 256], strides = [1, 1]} : vector<2x384xf32> to vector<2x256xf32>
    %97 = vector.broadcast %95 : vector<2x1xf32> to vector<2x256xf32>
    %98 = arith.mulf %97, %96 : vector<2x256xf32>
    %99 = arith.addf %93, %98 : vector<2x256xf32>
    %100 = vector.extract_strided_slice %99 {offsets = [0, 0], sizes = [1, 256], strides = [1, 1]} : vector<2x256xf32> to vector<1x256xf32>
    %101 = vector.extract_strided_slice %99 {offsets = [1, 0], sizes = [1, 256], strides = [1, 1]} : vector<2x256xf32> to vector<1x256xf32>
    %102 = arith.addf %100, %101 : vector<1x256xf32>
    %103 = vector.extract_strided_slice %12 {offsets = [1, 0], sizes = [1, 256], strides = [1, 1]} : vector<7x256xf32> to vector<1x256xf32>
    %104 = arith.mulf %102, %103 : vector<1x256xf32>
    %105 = arith.addf %58, %104 : vector<1x256xf32>
    %c2 = arith.constant 2 : index
    %c0_45 = arith.constant 0 : index
    %c0_46 = arith.constant 0 : index
    %106 = vector.load %arg2[%c2, %c0_45, %c0_46] : memref<49x2x1xf32, #tpu.memory_space<vmem>>, vector<1x2x1xf32>
    %107 = vector.shape_cast %106 : vector<1x2x1xf32> to vector<2x1xf32>
    %108 = vector.extract_strided_slice %11 {offsets = [0, 3], sizes = [2, 256], strides = [1, 1]} : vector<2x384xf32> to vector<2x256xf32>
    %109 = vector.broadcast %107 : vector<2x1xf32> to vector<2x256xf32>
    %110 = arith.mulf %109, %108 : vector<2x256xf32>
    %c9 = arith.constant 9 : index
    %c0_47 = arith.constant 0 : index
    %c0_48 = arith.constant 0 : index
    %111 = vector.load %arg2[%c9, %c0_47, %c0_48] : memref<49x2x1xf32, #tpu.memory_space<vmem>>, vector<1x2x1xf32>
    %112 = vector.shape_cast %111 : vector<1x2x1xf32> to vector<2x1xf32>
    %113 = vector.extract_strided_slice %11 {offsets = [0, 19], sizes = [2, 256], strides = [1, 1]} : vector<2x384xf32> to vector<2x256xf32>
    %114 = vector.broadcast %112 : vector<2x1xf32> to vector<2x256xf32>
    %115 = arith.mulf %114, %113 : vector<2x256xf32>
    %116 = arith.addf %110, %115 : vector<2x256xf32>
    %c16 = arith.constant 16 : index
    %c0_49 = arith.constant 0 : index
    %c0_50 = arith.constant 0 : index
    %117 = vector.load %arg2[%c16, %c0_49, %c0_50] : memref<49x2x1xf32, #tpu.memory_space<vmem>>, vector<1x2x1xf32>
    %118 = vector.shape_cast %117 : vector<1x2x1xf32> to vector<2x1xf32>
    %119 = vector.extract_strided_slice %11 {offsets = [0, 35], sizes = [2, 256], strides = [1, 1]} : vector<2x384xf32> to vector<2x256xf32>
    %120 = vector.broadcast %118 : vector<2x1xf32> to vector<2x256xf32>
    %121 = arith.mulf %120, %119 : vector<2x256xf32>
    %122 = arith.addf %116, %121 : vector<2x256xf32>
    %c23 = arith.constant 23 : index
    %c0_51 = arith.constant 0 : index
    %c0_52 = arith.constant 0 : index
    %123 = vector.load %arg2[%c23, %c0_51, %c0_52] : memref<49x2x1xf32, #tpu.memory_space<vmem>>, vector<1x2x1xf32>
    %124 = vector.shape_cast %123 : vector<1x2x1xf32> to vector<2x1xf32>
    %125 = vector.extract_strided_slice %11 {offsets = [0, 51], sizes = [2, 256], strides = [1, 1]} : vector<2x384xf32> to vector<2x256xf32>
    %126 = vector.broadcast %124 : vector<2x1xf32> to vector<2x256xf32>
    %127 = arith.mulf %126, %125 : vector<2x256xf32>
    %128 = arith.addf %122, %127 : vector<2x256xf32>
    %c30 = arith.constant 30 : index
    %c0_53 = arith.constant 0 : index
    %c0_54 = arith.constant 0 : index
    %129 = vector.load %arg2[%c30, %c0_53, %c0_54] : memref<49x2x1xf32, #tpu.memory_space<vmem>>, vector<1x2x1xf32>
    %130 = vector.shape_cast %129 : vector<1x2x1xf32> to vector<2x1xf32>
    %131 = vector.extract_strided_slice %11 {offsets = [0, 67], sizes = [2, 256], strides = [1, 1]} : vector<2x384xf32> to vector<2x256xf32>
    %132 = vector.broadcast %130 : vector<2x1xf32> to vector<2x256xf32>
    %133 = arith.mulf %132, %131 : vector<2x256xf32>
    %134 = arith.addf %128, %133 : vector<2x256xf32>
    %c37 = arith.constant 37 : index
    %c0_55 = arith.constant 0 : index
    %c0_56 = arith.constant 0 : index
    %135 = vector.load %arg2[%c37, %c0_55, %c0_56] : memref<49x2x1xf32, #tpu.memory_space<vmem>>, vector<1x2x1xf32>
    %136 = vector.shape_cast %135 : vector<1x2x1xf32> to vector<2x1xf32>
    %137 = vector.extract_strided_slice %11 {offsets = [0, 83], sizes = [2, 256], strides = [1, 1]} : vector<2x384xf32> to vector<2x256xf32>
    %138 = vector.broadcast %136 : vector<2x1xf32> to vector<2x256xf32>
    %139 = arith.mulf %138, %137 : vector<2x256xf32>
    %140 = arith.addf %134, %139 : vector<2x256xf32>
    %c44 = arith.constant 44 : index
    %c0_57 = arith.constant 0 : index
    %c0_58 = arith.constant 0 : index
    %141 = vector.load %arg2[%c44, %c0_57, %c0_58] : memref<49x2x1xf32, #tpu.memory_space<vmem>>, vector<1x2x1xf32>
    %142 = vector.shape_cast %141 : vector<1x2x1xf32> to vector<2x1xf32>
    %143 = vector.extract_strided_slice %11 {offsets = [0, 99], sizes = [2, 256], strides = [1, 1]} : vector<2x384xf32> to vector<2x256xf32>
    %144 = vector.broadcast %142 : vector<2x1xf32> to vector<2x256xf32>
    %145 = arith.mulf %144, %143 : vector<2x256xf32>
    %146 = arith.addf %140, %145 : vector<2x256xf32>
    %147 = vector.extract_strided_slice %146 {offsets = [0, 0], sizes = [1, 256], strides = [1, 1]} : vector<2x256xf32> to vector<1x256xf32>
    %148 = vector.extract_strided_slice %146 {offsets = [1, 0], sizes = [1, 256], strides = [1, 1]} : vector<2x256xf32> to vector<1x256xf32>
    %149 = arith.addf %147, %148 : vector<1x256xf32>
    %150 = vector.extract_strided_slice %12 {offsets = [2, 0], sizes = [1, 256], strides = [1, 1]} : vector<7x256xf32> to vector<1x256xf32>
    %151 = arith.mulf %149, %150 : vector<1x256xf32>
    %152 = arith.addf %105, %151 : vector<1x256xf32>
    %c3 = arith.constant 3 : index
    %c0_59 = arith.constant 0 : index
    %c0_60 = arith.constant 0 : index
    %153 = vector.load %arg2[%c3, %c0_59, %c0_60] : memref<49x2x1xf32, #tpu.memory_space<vmem>>, vector<1x2x1xf32>
    %154 = vector.shape_cast %153 : vector<1x2x1xf32> to vector<2x1xf32>
    %155 = vector.extract_strided_slice %11 {offsets = [0, 4], sizes = [2, 256], strides = [1, 1]} : vector<2x384xf32> to vector<2x256xf32>
    %156 = vector.broadcast %154 : vector<2x1xf32> to vector<2x256xf32>
    %157 = arith.mulf %156, %155 : vector<2x256xf32>
    %c10 = arith.constant 10 : index
    %c0_61 = arith.constant 0 : index
    %c0_62 = arith.constant 0 : index
    %158 = vector.load %arg2[%c10, %c0_61, %c0_62] : memref<49x2x1xf32, #tpu.memory_space<vmem>>, vector<1x2x1xf32>
    %159 = vector.shape_cast %158 : vector<1x2x1xf32> to vector<2x1xf32>
    %160 = vector.extract_strided_slice %11 {offsets = [0, 20], sizes = [2, 256], strides = [1, 1]} : vector<2x384xf32> to vector<2x256xf32>
    %161 = vector.broadcast %159 : vector<2x1xf32> to vector<2x256xf32>
    %162 = arith.mulf %161, %160 : vector<2x256xf32>
    %163 = arith.addf %157, %162 : vector<2x256xf32>
    %c17 = arith.constant 17 : index
    %c0_63 = arith.constant 0 : index
    %c0_64 = arith.constant 0 : index
    %164 = vector.load %arg2[%c17, %c0_63, %c0_64] : memref<49x2x1xf32, #tpu.memory_space<vmem>>, vector<1x2x1xf32>
    %165 = vector.shape_cast %164 : vector<1x2x1xf32> to vector<2x1xf32>
    %166 = vector.extract_strided_slice %11 {offsets = [0, 36], sizes = [2, 256], strides = [1, 1]} : vector<2x384xf32> to vector<2x256xf32>
    %167 = vector.broadcast %165 : vector<2x1xf32> to vector<2x256xf32>
    %168 = arith.mulf %167, %166 : vector<2x256xf32>
    %169 = arith.addf %163, %168 : vector<2x256xf32>
    %c24 = arith.constant 24 : index
    %c0_65 = arith.constant 0 : index
    %c0_66 = arith.constant 0 : index
    %170 = vector.load %arg2[%c24, %c0_65, %c0_66] : memref<49x2x1xf32, #tpu.memory_space<vmem>>, vector<1x2x1xf32>
    %171 = vector.shape_cast %170 : vector<1x2x1xf32> to vector<2x1xf32>
    %172 = vector.extract_strided_slice %11 {offsets = [0, 52], sizes = [2, 256], strides = [1, 1]} : vector<2x384xf32> to vector<2x256xf32>
    %173 = vector.broadcast %171 : vector<2x1xf32> to vector<2x256xf32>
    %174 = arith.mulf %173, %172 : vector<2x256xf32>
    %175 = arith.addf %169, %174 : vector<2x256xf32>
    %c31 = arith.constant 31 : index
    %c0_67 = arith.constant 0 : index
    %c0_68 = arith.constant 0 : index
    %176 = vector.load %arg2[%c31, %c0_67, %c0_68] : memref<49x2x1xf32, #tpu.memory_space<vmem>>, vector<1x2x1xf32>
    %177 = vector.shape_cast %176 : vector<1x2x1xf32> to vector<2x1xf32>
    %178 = vector.extract_strided_slice %11 {offsets = [0, 68], sizes = [2, 256], strides = [1, 1]} : vector<2x384xf32> to vector<2x256xf32>
    %179 = vector.broadcast %177 : vector<2x1xf32> to vector<2x256xf32>
    %180 = arith.mulf %179, %178 : vector<2x256xf32>
    %181 = arith.addf %175, %180 : vector<2x256xf32>
    %c38 = arith.constant 38 : index
    %c0_69 = arith.constant 0 : index
    %c0_70 = arith.constant 0 : index
    %182 = vector.load %arg2[%c38, %c0_69, %c0_70] : memref<49x2x1xf32, #tpu.memory_space<vmem>>, vector<1x2x1xf32>
    %183 = vector.shape_cast %182 : vector<1x2x1xf32> to vector<2x1xf32>
    %184 = vector.extract_strided_slice %11 {offsets = [0, 84], sizes = [2, 256], strides = [1, 1]} : vector<2x384xf32> to vector<2x256xf32>
    %185 = vector.broadcast %183 : vector<2x1xf32> to vector<2x256xf32>
    %186 = arith.mulf %185, %184 : vector<2x256xf32>
    %187 = arith.addf %181, %186 : vector<2x256xf32>
    %c45 = arith.constant 45 : index
    %c0_71 = arith.constant 0 : index
    %c0_72 = arith.constant 0 : index
    %188 = vector.load %arg2[%c45, %c0_71, %c0_72] : memref<49x2x1xf32, #tpu.memory_space<vmem>>, vector<1x2x1xf32>
    %189 = vector.shape_cast %188 : vector<1x2x1xf32> to vector<2x1xf32>
    %190 = vector.extract_strided_slice %11 {offsets = [0, 100], sizes = [2, 256], strides = [1, 1]} : vector<2x384xf32> to vector<2x256xf32>
    %191 = vector.broadcast %189 : vector<2x1xf32> to vector<2x256xf32>
    %192 = arith.mulf %191, %190 : vector<2x256xf32>
    %193 = arith.addf %187, %192 : vector<2x256xf32>
    %194 = vector.extract_strided_slice %193 {offsets = [0, 0], sizes = [1, 256], strides = [1, 1]} : vector<2x256xf32> to vector<1x256xf32>
    %195 = vector.extract_strided_slice %193 {offsets = [1, 0], sizes = [1, 256], strides = [1, 1]} : vector<2x256xf32> to vector<1x256xf32>
    %196 = arith.addf %194, %195 : vector<1x256xf32>
    %197 = vector.extract_strided_slice %12 {offsets = [3, 0], sizes = [1, 256], strides = [1, 1]} : vector<7x256xf32> to vector<1x256xf32>
    %198 = arith.mulf %196, %197 : vector<1x256xf32>
    %199 = arith.addf %152, %198 : vector<1x256xf32>
    %c4 = arith.constant 4 : index
    %c0_73 = arith.constant 0 : index
    %c0_74 = arith.constant 0 : index
    %200 = vector.load %arg2[%c4, %c0_73, %c0_74] : memref<49x2x1xf32, #tpu.memory_space<vmem>>, vector<1x2x1xf32>
    %201 = vector.shape_cast %200 : vector<1x2x1xf32> to vector<2x1xf32>
    %202 = vector.extract_strided_slice %11 {offsets = [0, 5], sizes = [2, 256], strides = [1, 1]} : vector<2x384xf32> to vector<2x256xf32>
    %203 = vector.broadcast %201 : vector<2x1xf32> to vector<2x256xf32>
    %204 = arith.mulf %203, %202 : vector<2x256xf32>
    %c11 = arith.constant 11 : index
    %c0_75 = arith.constant 0 : index
    %c0_76 = arith.constant 0 : index
    %205 = vector.load %arg2[%c11, %c0_75, %c0_76] : memref<49x2x1xf32, #tpu.memory_space<vmem>>, vector<1x2x1xf32>
    %206 = vector.shape_cast %205 : vector<1x2x1xf32> to vector<2x1xf32>
    %207 = vector.extract_strided_slice %11 {offsets = [0, 21], sizes = [2, 256], strides = [1, 1]} : vector<2x384xf32> to vector<2x256xf32>
    %208 = vector.broadcast %206 : vector<2x1xf32> to vector<2x256xf32>
    %209 = arith.mulf %208, %207 : vector<2x256xf32>
    %210 = arith.addf %204, %209 : vector<2x256xf32>
    %c18 = arith.constant 18 : index
    %c0_77 = arith.constant 0 : index
    %c0_78 = arith.constant 0 : index
    %211 = vector.load %arg2[%c18, %c0_77, %c0_78] : memref<49x2x1xf32, #tpu.memory_space<vmem>>, vector<1x2x1xf32>
    %212 = vector.shape_cast %211 : vector<1x2x1xf32> to vector<2x1xf32>
    %213 = vector.extract_strided_slice %11 {offsets = [0, 37], sizes = [2, 256], strides = [1, 1]} : vector<2x384xf32> to vector<2x256xf32>
    %214 = vector.broadcast %212 : vector<2x1xf32> to vector<2x256xf32>
    %215 = arith.mulf %214, %213 : vector<2x256xf32>
    %216 = arith.addf %210, %215 : vector<2x256xf32>
    %c25 = arith.constant 25 : index
    %c0_79 = arith.constant 0 : index
    %c0_80 = arith.constant 0 : index
    %217 = vector.load %arg2[%c25, %c0_79, %c0_80] : memref<49x2x1xf32, #tpu.memory_space<vmem>>, vector<1x2x1xf32>
    %218 = vector.shape_cast %217 : vector<1x2x1xf32> to vector<2x1xf32>
    %219 = vector.extract_strided_slice %11 {offsets = [0, 53], sizes = [2, 256], strides = [1, 1]} : vector<2x384xf32> to vector<2x256xf32>
    %220 = vector.broadcast %218 : vector<2x1xf32> to vector<2x256xf32>
    %221 = arith.mulf %220, %219 : vector<2x256xf32>
    %222 = arith.addf %216, %221 : vector<2x256xf32>
    %c32 = arith.constant 32 : index
    %c0_81 = arith.constant 0 : index
    %c0_82 = arith.constant 0 : index
    %223 = vector.load %arg2[%c32, %c0_81, %c0_82] : memref<49x2x1xf32, #tpu.memory_space<vmem>>, vector<1x2x1xf32>
    %224 = vector.shape_cast %223 : vector<1x2x1xf32> to vector<2x1xf32>
    %225 = vector.extract_strided_slice %11 {offsets = [0, 69], sizes = [2, 256], strides = [1, 1]} : vector<2x384xf32> to vector<2x256xf32>
    %226 = vector.broadcast %224 : vector<2x1xf32> to vector<2x256xf32>
    %227 = arith.mulf %226, %225 : vector<2x256xf32>
    %228 = arith.addf %222, %227 : vector<2x256xf32>
    %c39 = arith.constant 39 : index
    %c0_83 = arith.constant 0 : index
    %c0_84 = arith.constant 0 : index
    %229 = vector.load %arg2[%c39, %c0_83, %c0_84] : memref<49x2x1xf32, #tpu.memory_space<vmem>>, vector<1x2x1xf32>
    %230 = vector.shape_cast %229 : vector<1x2x1xf32> to vector<2x1xf32>
    %231 = vector.extract_strided_slice %11 {offsets = [0, 85], sizes = [2, 256], strides = [1, 1]} : vector<2x384xf32> to vector<2x256xf32>
    %232 = vector.broadcast %230 : vector<2x1xf32> to vector<2x256xf32>
    %233 = arith.mulf %232, %231 : vector<2x256xf32>
    %234 = arith.addf %228, %233 : vector<2x256xf32>
    %c46 = arith.constant 46 : index
    %c0_85 = arith.constant 0 : index
    %c0_86 = arith.constant 0 : index
    %235 = vector.load %arg2[%c46, %c0_85, %c0_86] : memref<49x2x1xf32, #tpu.memory_space<vmem>>, vector<1x2x1xf32>
    %236 = vector.shape_cast %235 : vector<1x2x1xf32> to vector<2x1xf32>
    %237 = vector.extract_strided_slice %11 {offsets = [0, 101], sizes = [2, 256], strides = [1, 1]} : vector<2x384xf32> to vector<2x256xf32>
    %238 = vector.broadcast %236 : vector<2x1xf32> to vector<2x256xf32>
    %239 = arith.mulf %238, %237 : vector<2x256xf32>
    %240 = arith.addf %234, %239 : vector<2x256xf32>
    %241 = vector.extract_strided_slice %240 {offsets = [0, 0], sizes = [1, 256], strides = [1, 1]} : vector<2x256xf32> to vector<1x256xf32>
    %242 = vector.extract_strided_slice %240 {offsets = [1, 0], sizes = [1, 256], strides = [1, 1]} : vector<2x256xf32> to vector<1x256xf32>
    %243 = arith.addf %241, %242 : vector<1x256xf32>
    %244 = vector.extract_strided_slice %12 {offsets = [4, 0], sizes = [1, 256], strides = [1, 1]} : vector<7x256xf32> to vector<1x256xf32>
    %245 = arith.mulf %243, %244 : vector<1x256xf32>
    %246 = arith.addf %199, %245 : vector<1x256xf32>
    %c5 = arith.constant 5 : index
    %c0_87 = arith.constant 0 : index
    %c0_88 = arith.constant 0 : index
    %247 = vector.load %arg2[%c5, %c0_87, %c0_88] : memref<49x2x1xf32, #tpu.memory_space<vmem>>, vector<1x2x1xf32>
    %248 = vector.shape_cast %247 : vector<1x2x1xf32> to vector<2x1xf32>
    %249 = vector.extract_strided_slice %11 {offsets = [0, 6], sizes = [2, 256], strides = [1, 1]} : vector<2x384xf32> to vector<2x256xf32>
    %250 = vector.broadcast %248 : vector<2x1xf32> to vector<2x256xf32>
    %251 = arith.mulf %250, %249 : vector<2x256xf32>
    %c12 = arith.constant 12 : index
    %c0_89 = arith.constant 0 : index
    %c0_90 = arith.constant 0 : index
    %252 = vector.load %arg2[%c12, %c0_89, %c0_90] : memref<49x2x1xf32, #tpu.memory_space<vmem>>, vector<1x2x1xf32>
    %253 = vector.shape_cast %252 : vector<1x2x1xf32> to vector<2x1xf32>
    %254 = vector.extract_strided_slice %11 {offsets = [0, 22], sizes = [2, 256], strides = [1, 1]} : vector<2x384xf32> to vector<2x256xf32>
    %255 = vector.broadcast %253 : vector<2x1xf32> to vector<2x256xf32>
    %256 = arith.mulf %255, %254 : vector<2x256xf32>
    %257 = arith.addf %251, %256 : vector<2x256xf32>
    %c19 = arith.constant 19 : index
    %c0_91 = arith.constant 0 : index
    %c0_92 = arith.constant 0 : index
    %258 = vector.load %arg2[%c19, %c0_91, %c0_92] : memref<49x2x1xf32, #tpu.memory_space<vmem>>, vector<1x2x1xf32>
    %259 = vector.shape_cast %258 : vector<1x2x1xf32> to vector<2x1xf32>
    %260 = vector.extract_strided_slice %11 {offsets = [0, 38], sizes = [2, 256], strides = [1, 1]} : vector<2x384xf32> to vector<2x256xf32>
    %261 = vector.broadcast %259 : vector<2x1xf32> to vector<2x256xf32>
    %262 = arith.mulf %261, %260 : vector<2x256xf32>
    %263 = arith.addf %257, %262 : vector<2x256xf32>
    %c26 = arith.constant 26 : index
    %c0_93 = arith.constant 0 : index
    %c0_94 = arith.constant 0 : index
    %264 = vector.load %arg2[%c26, %c0_93, %c0_94] : memref<49x2x1xf32, #tpu.memory_space<vmem>>, vector<1x2x1xf32>
    %265 = vector.shape_cast %264 : vector<1x2x1xf32> to vector<2x1xf32>
    %266 = vector.extract_strided_slice %11 {offsets = [0, 54], sizes = [2, 256], strides = [1, 1]} : vector<2x384xf32> to vector<2x256xf32>
    %267 = vector.broadcast %265 : vector<2x1xf32> to vector<2x256xf32>
    %268 = arith.mulf %267, %266 : vector<2x256xf32>
    %269 = arith.addf %263, %268 : vector<2x256xf32>
    %c33 = arith.constant 33 : index
    %c0_95 = arith.constant 0 : index
    %c0_96 = arith.constant 0 : index
    %270 = vector.load %arg2[%c33, %c0_95, %c0_96] : memref<49x2x1xf32, #tpu.memory_space<vmem>>, vector<1x2x1xf32>
    %271 = vector.shape_cast %270 : vector<1x2x1xf32> to vector<2x1xf32>
    %272 = vector.extract_strided_slice %11 {offsets = [0, 70], sizes = [2, 256], strides = [1, 1]} : vector<2x384xf32> to vector<2x256xf32>
    %273 = vector.broadcast %271 : vector<2x1xf32> to vector<2x256xf32>
    %274 = arith.mulf %273, %272 : vector<2x256xf32>
    %275 = arith.addf %269, %274 : vector<2x256xf32>
    %c40 = arith.constant 40 : index
    %c0_97 = arith.constant 0 : index
    %c0_98 = arith.constant 0 : index
    %276 = vector.load %arg2[%c40, %c0_97, %c0_98] : memref<49x2x1xf32, #tpu.memory_space<vmem>>, vector<1x2x1xf32>
    %277 = vector.shape_cast %276 : vector<1x2x1xf32> to vector<2x1xf32>
    %278 = vector.extract_strided_slice %11 {offsets = [0, 86], sizes = [2, 256], strides = [1, 1]} : vector<2x384xf32> to vector<2x256xf32>
    %279 = vector.broadcast %277 : vector<2x1xf32> to vector<2x256xf32>
    %280 = arith.mulf %279, %278 : vector<2x256xf32>
    %281 = arith.addf %275, %280 : vector<2x256xf32>
    %c47 = arith.constant 47 : index
    %c0_99 = arith.constant 0 : index
    %c0_100 = arith.constant 0 : index
    %282 = vector.load %arg2[%c47, %c0_99, %c0_100] : memref<49x2x1xf32, #tpu.memory_space<vmem>>, vector<1x2x1xf32>
    %283 = vector.shape_cast %282 : vector<1x2x1xf32> to vector<2x1xf32>
    %284 = vector.extract_strided_slice %11 {offsets = [0, 102], sizes = [2, 256], strides = [1, 1]} : vector<2x384xf32> to vector<2x256xf32>
    %285 = vector.broadcast %283 : vector<2x1xf32> to vector<2x256xf32>
    %286 = arith.mulf %285, %284 : vector<2x256xf32>
    %287 = arith.addf %281, %286 : vector<2x256xf32>
    %288 = vector.extract_strided_slice %287 {offsets = [0, 0], sizes = [1, 256], strides = [1, 1]} : vector<2x256xf32> to vector<1x256xf32>
    %289 = vector.extract_strided_slice %287 {offsets = [1, 0], sizes = [1, 256], strides = [1, 1]} : vector<2x256xf32> to vector<1x256xf32>
    %290 = arith.addf %288, %289 : vector<1x256xf32>
    %291 = vector.extract_strided_slice %12 {offsets = [5, 0], sizes = [1, 256], strides = [1, 1]} : vector<7x256xf32> to vector<1x256xf32>
    %292 = arith.mulf %290, %291 : vector<1x256xf32>
    %293 = arith.addf %246, %292 : vector<1x256xf32>
    %c6 = arith.constant 6 : index
    %c0_101 = arith.constant 0 : index
    %c0_102 = arith.constant 0 : index
    %294 = vector.load %arg2[%c6, %c0_101, %c0_102] : memref<49x2x1xf32, #tpu.memory_space<vmem>>, vector<1x2x1xf32>
    %295 = vector.shape_cast %294 : vector<1x2x1xf32> to vector<2x1xf32>
    %296 = vector.extract_strided_slice %11 {offsets = [0, 7], sizes = [2, 256], strides = [1, 1]} : vector<2x384xf32> to vector<2x256xf32>
    %297 = vector.broadcast %295 : vector<2x1xf32> to vector<2x256xf32>
    %298 = arith.mulf %297, %296 : vector<2x256xf32>
    %c13 = arith.constant 13 : index
    %c0_103 = arith.constant 0 : index
    %c0_104 = arith.constant 0 : index
    %299 = vector.load %arg2[%c13, %c0_103, %c0_104] : memref<49x2x1xf32, #tpu.memory_space<vmem>>, vector<1x2x1xf32>
    %300 = vector.shape_cast %299 : vector<1x2x1xf32> to vector<2x1xf32>
    %301 = vector.extract_strided_slice %11 {offsets = [0, 23], sizes = [2, 256], strides = [1, 1]} : vector<2x384xf32> to vector<2x256xf32>
    %302 = vector.broadcast %300 : vector<2x1xf32> to vector<2x256xf32>
    %303 = arith.mulf %302, %301 : vector<2x256xf32>
    %304 = arith.addf %298, %303 : vector<2x256xf32>
    %c20 = arith.constant 20 : index
    %c0_105 = arith.constant 0 : index
    %c0_106 = arith.constant 0 : index
    %305 = vector.load %arg2[%c20, %c0_105, %c0_106] : memref<49x2x1xf32, #tpu.memory_space<vmem>>, vector<1x2x1xf32>
    %306 = vector.shape_cast %305 : vector<1x2x1xf32> to vector<2x1xf32>
    %307 = vector.extract_strided_slice %11 {offsets = [0, 39], sizes = [2, 256], strides = [1, 1]} : vector<2x384xf32> to vector<2x256xf32>
    %308 = vector.broadcast %306 : vector<2x1xf32> to vector<2x256xf32>
    %309 = arith.mulf %308, %307 : vector<2x256xf32>
    %310 = arith.addf %304, %309 : vector<2x256xf32>
    %c27 = arith.constant 27 : index
    %c0_107 = arith.constant 0 : index
    %c0_108 = arith.constant 0 : index
    %311 = vector.load %arg2[%c27, %c0_107, %c0_108] : memref<49x2x1xf32, #tpu.memory_space<vmem>>, vector<1x2x1xf32>
    %312 = vector.shape_cast %311 : vector<1x2x1xf32> to vector<2x1xf32>
    %313 = vector.extract_strided_slice %11 {offsets = [0, 55], sizes = [2, 256], strides = [1, 1]} : vector<2x384xf32> to vector<2x256xf32>
    %314 = vector.broadcast %312 : vector<2x1xf32> to vector<2x256xf32>
    %315 = arith.mulf %314, %313 : vector<2x256xf32>
    %316 = arith.addf %310, %315 : vector<2x256xf32>
    %c34 = arith.constant 34 : index
    %c0_109 = arith.constant 0 : index
    %c0_110 = arith.constant 0 : index
    %317 = vector.load %arg2[%c34, %c0_109, %c0_110] : memref<49x2x1xf32, #tpu.memory_space<vmem>>, vector<1x2x1xf32>
    %318 = vector.shape_cast %317 : vector<1x2x1xf32> to vector<2x1xf32>
    %319 = vector.extract_strided_slice %11 {offsets = [0, 71], sizes = [2, 256], strides = [1, 1]} : vector<2x384xf32> to vector<2x256xf32>
    %320 = vector.broadcast %318 : vector<2x1xf32> to vector<2x256xf32>
    %321 = arith.mulf %320, %319 : vector<2x256xf32>
    %322 = arith.addf %316, %321 : vector<2x256xf32>
    %c41 = arith.constant 41 : index
    %c0_111 = arith.constant 0 : index
    %c0_112 = arith.constant 0 : index
    %323 = vector.load %arg2[%c41, %c0_111, %c0_112] : memref<49x2x1xf32, #tpu.memory_space<vmem>>, vector<1x2x1xf32>
    %324 = vector.shape_cast %323 : vector<1x2x1xf32> to vector<2x1xf32>
    %325 = vector.extract_strided_slice %11 {offsets = [0, 87], sizes = [2, 256], strides = [1, 1]} : vector<2x384xf32> to vector<2x256xf32>
    %326 = vector.broadcast %324 : vector<2x1xf32> to vector<2x256xf32>
    %327 = arith.mulf %326, %325 : vector<2x256xf32>
    %328 = arith.addf %322, %327 : vector<2x256xf32>
    %c48 = arith.constant 48 : index
    %c0_113 = arith.constant 0 : index
    %c0_114 = arith.constant 0 : index
    %329 = vector.load %arg2[%c48, %c0_113, %c0_114] : memref<49x2x1xf32, #tpu.memory_space<vmem>>, vector<1x2x1xf32>
    %330 = vector.shape_cast %329 : vector<1x2x1xf32> to vector<2x1xf32>
    %331 = vector.extract_strided_slice %11 {offsets = [0, 103], sizes = [2, 256], strides = [1, 1]} : vector<2x384xf32> to vector<2x256xf32>
    %332 = vector.broadcast %330 : vector<2x1xf32> to vector<2x256xf32>
    %333 = arith.mulf %332, %331 : vector<2x256xf32>
    %334 = arith.addf %328, %333 : vector<2x256xf32>
    %335 = vector.extract_strided_slice %334 {offsets = [0, 0], sizes = [1, 256], strides = [1, 1]} : vector<2x256xf32> to vector<1x256xf32>
    %336 = vector.extract_strided_slice %334 {offsets = [1, 0], sizes = [1, 256], strides = [1, 1]} : vector<2x256xf32> to vector<1x256xf32>
    %337 = arith.addf %335, %336 : vector<1x256xf32>
    %338 = vector.extract_strided_slice %12 {offsets = [6, 0], sizes = [1, 256], strides = [1, 1]} : vector<7x256xf32> to vector<1x256xf32>
    %339 = arith.mulf %337, %338 : vector<1x256xf32>
    %340 = arith.addf %293, %339 : vector<1x256xf32>
    %341 = arith.negf %340 : vector<1x256xf32>
    %342 = math.exp %341 : vector<1x256xf32>
    %cst_115 = arith.constant 1.000000e+00 : f32
    %343 = vector.broadcast %cst_115 : f32 to vector<1x256xf32>
    %344 = arith.addf %343, %342 : vector<1x256xf32>
    %345 = arith.divf %343, %344 : vector<1x256xf32>
    %346 = vector.shape_cast %345 : vector<1x256xf32> to vector<1x1x256xf32>
    %347 = vector.broadcast %346 : vector<1x1x256xf32> to vector<1x4x256xf32>
    %348 = arith.mulf %0, %347 : vector<1x4x256xf32>
    %c0_116 = arith.constant 0 : index
    %c0_117 = arith.constant 0 : index
    %c0_118 = arith.constant 0 : index
    %349 = vector.load %arg4[%c0_116, %c0_117, %c0_118] : memref<1x4x256xf32, #tpu.memory_space<vmem>>, vector<1x4x256xf32>
    tpu.vector_store %arg4[%c0_116, %c0_117, %c0_118], %348 {strides = array<i32>} : memref<1x4x256xf32, #tpu.memory_space<vmem>>, vector<1x4x256xf32>,
    return
  }
  func.func @transform_0(%arg0: i32) -> (i32, i32) {
    %c0_i32 = arith.constant 0 : i32
    %c0_i32_0 = arith.constant 0 : i32
    %c0_i32_1 = arith.constant 0 : i32
    return %c0_i32, %c0_i32_0 : i32, i32
  }
  func.func @transform_1(%arg0: i32) -> (i32, i32, i32) {
    %c0_i32 = arith.constant 0 : i32
    %c0_i32_0 = arith.constant 0 : i32
    %c0_i32_1 = arith.constant 0 : i32
    %c0_i32_2 = arith.constant 0 : i32
    return %c0_i32, %c0_i32_0, %c0_i32_1 : i32, i32, i32
  }
  func.func @transform_2(%arg0: i32) -> (i32, i32, i32) {
    %c0_i32 = arith.constant 0 : i32
    %c0_i32_0 = arith.constant 0 : i32
    %c0_i32_1 = arith.constant 0 : i32
    return %arg0, %c0_i32, %c0_i32_0 : i32, i32, i32
  }
  func.func @transform_3(%arg0: i32) -> (i32, i32, i32) {
    %c0_i32 = arith.constant 0 : i32
    %c0_i32_0 = arith.constant 0 : i32
    %c0_i32_1 = arith.constant 0 : i32
    return %arg0, %c0_i32, %c0_i32_0 : i32, i32, i32
  }
}

</mosaic_0001>

<bundles_post_ra>
// kernel: tpu_custom_call.1
= control target key start
LH: loop header
LB: loop body
LE: loop exit
PB: predicated region body
PF: predicated region fallthrough
CT: control target
= control target key end

     0   :  { %8 = vsyncpa [#allocation4], 0  ;;  %s3015_s0 = inlined_call_operand.vmem [shape: f32[7,256], index: 0, kind: input, shape index: {}]   ;;  %s3016_s1 = inlined_call_operand.vmem [shape: f32[49,2,1], index: 1, kind: input, shape index: {}]   ;;  %s3017_s2 = inlined_call_operand.vmem [shape: f32[2,4,256], index: 2, kind: input, shape index: {}]   ;;  %s3018_s3 = inlined_call_operand.hbm [shape: f32[2,4,256], index: 3, kind: output, shape index: {}]  }
   0x1   :  { %10 = vsyncpa [#allocation4 + $0x1], 0  ;;  %s1860_s12 = smov 0   ;;  %s1862_s13 = smov 0  }
   0x2   :  { %s1864_s14 = smov 0   ;;  %s1866_s15 = smov 0  }
   0x3 LB: > { %s1881_s16 = sadd.s32 4294967295, %s1783_s15   ;;  %s1551_s17 = sadd.s32 4294967294, %s1783_s15   ;;  %s1783_s15 = sphi %s1866_s15, %s3229_s15   ;;  %s1779_s14 = sphi %s1864_s14, %s3228_s14   ;;  %s1775_s13 = sphi %s1862_s13, %s3227_s13   ;;  %s1771_s12 = sphi %s1860_s12, %s3226_s12  }
   0x4   : > { %s1885_s18 = sadd.s32 1, %s1783_s15   ;;  %s91_s19 = sadd.s32 1, %s1779_s14 }
   0x5   : > { %s88_s20 = ssub.s32 %s1783_s15, %s1885_s18  ;;  %p101_p0 = scmp.ne.s32.totalorder %s1779_s14, %s1775_s13 }
   0x6   : > { %p89_p1 = scmp.eq.s32.totalorder %s88_s20, 0  ;;  %p102_p2 = scmp.eq.s32.totalorder %s1881_s16, 1 }
   0x7   : > { %p107_p3 = scmp.ne.s32.totalorder %s1775_s13, %s1771_s12  ;;  %p108_p4 = scmp.eq.s32.totalorder %s1551_s17, 1 }
   0x8   : > { %s1896_s21 = scalar_select %p89_p1, %s1779_s14, %s91_s19  }
   0x9   : > { %p1898_p5 = por %p102_p2, %p101_p0  ;;  %p1902_p6 = por %p108_p4, %p107_p3 }
   0xa   : > { %p1554_p7 = scmp.ge.s32.totalorder %s1783_s15, 1  ;;  %p140_p8 = scmp.lt.s32.totalorder %s1783_s15, 3 }
   0xc   : > { %p141_p9 = pnand %p1554_p7, %p140_p8 }
   0xe   : > { %144 = sbr.rel (%p141_p9) target bundleno = 748 (0x2ec), region = 32 }
  0x15   : > { %v1558_v0 = vld [vmem:[%s3016_s1 + $0xe] sm:$0x3]  ;;  %p164_p10 = scmp.lt.s32.totalorder %s1881_s16, 1  ;;  %v1785_v1 = vmov 0   ;;  %v263_v2 = vld [vmem:[%s3016_s1] sm:$0x3]  ;;  %v214_v20 = vlaneseq }
  0x16   : > { %1709 = vset.pattern.permute.xlu0 %v1785_v1  ;;  %1708 = vset.pattern.permute.xlu1 %v1785_v1  ;;  %v1559_v3 = vld [vmem:[%s3016_s1 + $0x1c] sm:$0x3]  ;;  %vm173_vm0 = vcmask 1043456   ;;  %vm204_vm1 = vcmask 418816   ;;  %v1560_v8 = vld [vmem:[%s3016_s1 + $0x2a] sm:$0x3] }
  0x17   : > { %303 = vperm.xlu0 %1709, %v1558_v0   ;;  %s165_s28 = scalar_select %p164_p10, %s1881_s16, 1  ;;  %266 = vperm.xlu1 %1708, %v263_v2   ;;  %v1786_v9 = vmov 0.0   ;;  %vm206_vm2 = vcmask 1041824   ;;  %v1787_v18 = vmov 1966171168   ;;  %v1932_v31 = vshrl.u32 %v214_v20, 7 }
  0x18   : > { %205 = vst.msk [vmem:[#allocation2] sm:$0x3] %vm204_vm1, %v1786_v9  ;;  %v212_v19 = vunpack.c.l.s4 %v1787_v18  ;;  %v1561_v21 = vld [vmem:[%s3016_s1 + $0x38] sm:$0x3]  ;;  %v1562_v32 = vld [vmem:[%s3016_s1 + $0x46] sm:$0x3] }
  0x19   : > { %s1613_s4 = sshll.u32 %s165_s28, 3  ;;  %207 = vst.msk [vmem:[#allocation2 + $0x4] sm:$0x3] %vm206_vm2, %v1786_v9  ;;  %3070 = vst [vmem:[#allocation6_spill] sm:$0xff] %v1932_v31  ;;  %v1563_v41 = vld [vmem:[%s3016_s1 + $0x54] sm:$0x3] }
  0x1a   : > { %s1922_s7 = scalar_lea.vmem %s3017_s2, %s1613_s4  ;;  %v213_v30 = vunpack.c.0.s8 %v212_v19  ;;  %v1564_v48 = vld [vmem:[%s3016_s1 + $0x2] sm:$0x3]  ;;  %v1565_v53 = vld [vmem:[%s3016_s1 + $0x10] sm:$0x3]  ;;  %s1788_s29 = smov 52   ;;  %vm232_vm3 = vcmp.ge.s32.totalorder %v214_v20, 52 }
  0x1b   : > { %v169_v4 = vld [vmem:[%s1922_s7] sm:$0xff]  ;;  %325 = vperm.xlu1 %1708, %v1559_v3   ;;  %v1566_v55 = vld [vmem:[%s3016_s1 + $0x1e] sm:$0x3]  ;;  %v1567_v56 = vld [vmem:[%s3016_s1 + $0x2c] sm:$0x3]  ;;  %vm233_vm4 = vcmp.lt.s32.totalorder %v214_v20, 308 }
  0x1c   : > { %v171_v5 = vcombine.high %v169_v4, %v169_v4  ;;  %v190_v6 = vsel %vm173_vm0, %v169_v4, -inf  ;;  %v174_v7 = vsel %vm173_vm0, %v169_v4, 0.0  ;;  %v216_v43 = vsub.s32 %v213_v30, %v1932_v31  ;;  %v1568_v57 = vld [vmem:[%s3016_s1 + $0x3a] sm:$0x3]  ;;  %v1569_v58 = vld [vmem:[%s3016_s1 + $0x48] sm:$0x3]  ;;  %vm234_vm6 = vmand %vm232_vm3, %vm233_vm4 }
  0x1d   : > { %v191_v10 = vrot.slane %v190_v6, 4  ;;  %v175_v11 = vrot.slane %v174_v7, 4  ;;  %v1570_v59 = vld [vmem:[%s3016_s1 + $0x56] sm:$0x3]  ;;  %v1571_v60 = vld [vmem:[%s3016_s1 + $0x4] sm:$0x3] }
  0x1e   : > { %v197_v12 = vsel %vm173_vm0, %v171_v5, -inf  ;;  %v181_v13 = vsel %vm173_vm0, %v171_v5, 0.0  ;;  %v1572_v61 = vld [vmem:[%s3016_s1 + $0x12] sm:$0x3]  ;;  %v1573_v62 = vld [vmem:[%s3016_s1 + $0x20] sm:$0x3] }
  0x1f   : > { %v192_v14 = vmax.f32 %v190_v6, %v191_v10  ;;  %v198_v15 = vrot.slane %v197_v12, 4  ;;  %v176_v16 = vadd.f32 %v175_v11, %v174_v7  ;;  %v182_v17 = vrot.slane %v181_v13, 4  ;;  %347 = vperm.xlu1 %1708, %v1560_v8   ;;  %v1574_v63 = vld [vmem:[%s3016_s1 + $0x2e] sm:$0x3]  ;;  %v1575_v0 = vld [vmem:[%s3016_s1 + $0x3c] sm:$0x3] }
  0x20   : > { %v1576_v1 = vld [vmem:[%s3016_s1 + $0x4a] sm:$0x3]  ;;  %vm228_vm5 = vcmask 424960   ;;  %v1789_v6 = vmov 1983009808   ;;  %s1790_s9 = smov 95  }
  0x21   : > { %v193_v22 = vrot.slane %v192_v14, 2  ;;  %v199_v23 = vmax.f32 %v197_v12, %v198_v15  ;;  %v177_v24 = vrot.slane %v176_v16, 2  ;;  %v183_v25 = vadd.f32 %v182_v17, %v181_v13  ;;  %s1791_s10 = smov 127   ;;  %s1792_s11 = smov 79  }
  0x22   : > { %v272_v7 = vunpack.c.l.s4 %v1789_v6  ;;  %s1793_s17 = smov 111   ;;  %s1794_s19 = smov 63   ;;  %v1586_v6 = vld [vmem:[%s3016_s1 + $0x16] sm:$0x3]  ;;  %vm812_vm7 = vcmask 883712   ;;  %vm792_vm8 = vcmask 1014784  }
  0x23   : > { %v194_v26 = vmax.f32 %v192_v14, %v193_v22  ;;  %v200_v27 = vrot.slane %v199_v23, 2  ;;  %v178_v28 = vadd.f32 %v177_v24, %v176_v16  ;;  %v184_v29 = vrot.slane %v183_v25, 2  ;;  %369 = vperm.xlu1 %1708, %v1561_v21   ;;  %s1795_s20 = smov 47   ;;  %s1796_s24 = smov 31  }
  0x24   : > { %v273_v11 = vunpack.c.0.s8 %v272_v7  ;;  %s1797_s25 = smov 126   ;;  %s1798_s26 = smov 110   ;;  %vm834_vm9 = vcmask 752640   ;;  %vm856_vm10 = vcmask 621568   ;;  %vm878_vm11 = vcmask 490496  }
  0x25   : > { %v195_v33 = vrot.slane %v194_v26, 1  ;;  %v201_v34 = vmax.f32 %v199_v23, %v200_v27  ;;  %v179_v35 = vrot.slane %v178_v28, 1  ;;  %v185_v36 = vadd.f32 %v184_v29, %v183_v25  ;;  %s3019_s27 = smov 94   ;;  %s3020_s28 = smov 78  }
  0x26   : > { %v276_v12 = vsub.s32 %v273_v11, %v1932_v31  ;;  %s1802_s30 = smov 46   ;;  %s1803_s4 = smov 30   ;;  %v1587_v11 = vld [vmem:[%s3016_s1 + $0x24] sm:$0x3]  ;;  %vm900_vm12 = vcmask 359424   ;;  %vm922_vm13 = vcmask 228352  }
  0x27   : > { %v196_v37 = vmax.f32 %v194_v26, %v195_v33  ;;  %v202_v38 = vrot.slane %v201_v34, 1  ;;  %v180_v39 = vadd.f32 %v179_v35, %v178_v28  ;;  %v186_v40 = vrot.slane %v185_v36, 1  ;;  %391 = vperm.xlu1 %1708, %v1562_v32   ;;  %s1804_s5 = smov 125   ;;  %s1805_s6 = smov 109  }
  0x28   : > { %s1806_s8 = smov 93   ;;  %vm3053_vm14 = vcmask 1039360   ;;  %vm312_vm15 = vcmask 908288   ;;  %vm960_vm0 = vcmask 1006592   ;;  %vm334_vm1 = vcmask 777216  }
  0x29   : > { %v203_v42 = vmax.f32 %v201_v34, %v202_v38  ;;  %v187_v44 = vadd.f32 %v186_v40, %v185_v36  ;;  %v188_v45 = vmul.f32 0.25, %v180_v39  ;;  %v1577_v34 = vld [vmem:[%s3016_s1 + $0x58] sm:$0x3]  ;;  %v1578_v36 = vld [vmem:[%s3016_s1 + $0x6] sm:$0x3]  ;;  %vm3052_vm2 = vcmask 900096  }
  0x2a   : > { %v1579_v38 = vld [vmem:[%s3016_s1 + $0x14] sm:$0x3]  ;;  %vm356_vm3 = vcmask 646144   ;;  %vm378_vm4 = vcmask 515072  }
  0x2b   : > { %v238_v46 = vcombine.low %v196_v37, %v203_v42  ;;  %v189_v47 = vmul.f32 0.25, %v187_v44  ;;  %413 = vperm.xlu1 %1708, %v1563_v41   ;;  %v1580_v41 = vld [vmem:[%s3016_s1 + $0x22] sm:$0x3]  ;;  %v1581_v44 = vld [vmem:[%s3016_s1 + $0x30] sm:$0x3] }
  0x2d   : > { %v245_v49 = vrot.slane %v238_v46, %v216_v43  ;;  %v210_v50 = vcombine.low %v188_v45, %v189_v47 }
  0x2f   : > { %v252_v51 = vrot.slane %v245_v49, %v216_v43  ;;  %v217_v52 = vrot.slane %v210_v50, %v216_v43  ;;  %445 = vperm.xlu1 %1708, %v1564_v48   ;;  %v1582_v49 = vld [vmem:[%s3016_s1 + $0x3e] sm:$0x3] }
  0x31   : > { %253 = vrot.lane.b32.xlu0 %v252_v51, %s1788_s29  ;;  %v224_v54 = vrot.slane %v217_v52, %v216_v43 }
  0x33   : > { %465 = vperm.xlu1 %1708, %v1565_v53  }
  0x35   : > { %225 = vrot.lane.b32.xlu0 %v224_v54, %s1788_s29  ;;  %s3021_s29 = smov 62   ;;  %v1583_v54 = vld [vmem:[%s3016_s1 + $0x4c] sm:$0x3] }
  0x37   : > { %487 = vperm.xlu1 %1708, %v1566_v55  }
  0x3b   : > { %509 = vperm.xlu1 %1708, %v1567_v56  }
  0x3f   : > { %531 = vperm.xlu1 %1708, %v1568_v57  }
  0x43   : > { %553 = vperm.xlu1 %1708, %v1569_v58  }
  0x47   : > { %575 = vperm.xlu1 %1708, %v1570_v59   ;;  %v1584_v59 = vld [vmem:[%s3016_s1 + $0x5a] sm:$0x3] }
  0x4b   : > { %615 = vperm.xlu1 %1708, %v1571_v60  }
  0x4f   : > { %635 = vperm.xlu1 %1708, %v1572_v61  }
  0x53   : > { %657 = vperm.xlu1 %1708, %v1573_v62  }
  0x57   : > { %679 = vperm.xlu1 %1708, %v1574_v63  }
  0x5b   : > { %701 = vperm.xlu1 %1708, %v1575_v0   ;;  %v1585_v0 = vld [vmem:[%s3016_s1 + $0x8] sm:$0x3] }
  0x5f   : > { %723 = vperm.xlu1 %1708, %v1576_v1  }
  0x96   : > { %v1980_v2 = vpop.permute.xlu0 %303  ;;  %v1991_v15 = vpop.permute.xlu1 %266 }
  0x9a   : > { %v1999_v18 = vpop.permute.xlu1 %325 }
  0x9e   : > { %v2013_v20 = vpop.permute.xlu1 %347 }
  0x9f   : > { %3071 = vst [vmem:[#allocation7_spill] sm:$0xff] %v2013_v20 }
  0xa2   : > { %v2019_v21 = vpop.permute.xlu1 %369 }
  0xa3   : > { %v254_v3 = vpop.permute.xlu0 %253  ;;  %3072 = vst [vmem:[#allocation8_spill] sm:$0xff] %v2019_v21 }
  0xa4   : > { %v255_v4 = vrot.slane %v254_v3, 7 }
  0xa6   : > { %v256_v5 = vsel %vm228_vm5, %v255_v4, %v254_v3  ;;  %v2029_v22 = vpop.permute.xlu1 %391 }
  0xa7   : > { %259 = vst.msk [vmem:[#allocation2 + $0x1] ss:$2 sm:$0x7] %vm234_vm6, %v256_v5  ;;  %v226_v8 = vpop.permute.xlu0 %225  ;;  %3073 = vst [vmem:[#allocation9_spill] sm:$0xff] %v2029_v22 }
  0xa8   : > { %v227_v9 = vrot.slane %v226_v8, 7 }
  0xaa   : > { %v229_v10 = vsel %vm228_vm5, %v227_v9, %v226_v8  ;;  %v2035_v23 = vpop.permute.xlu1 %413  ;;  %vm400_vm5 = vcmask 384000  }
  0xab   : > { %235 = vst.msk [vmem:[#allocation2] ss:$2 sm:$0x7] %vm234_vm6, %v229_v10  ;;  %3074 = vst [vmem:[#allocation10_spill] sm:$0xff] %v2035_v23  ;;  %vm3055_vm6 = vcmask 1031168  }
  0xae   : > { %v2045_v24 = vpop.permute.xlu1 %445 }
  0xb2   : > { %v260_v13 = vld [vmem:[#allocation2] sm:$0x3f]  ;;  %v2051_v25 = vpop.permute.xlu1 %465 }
  0xb3   : > { %v1985_v14 = vrot.slane %v260_v13, %v276_v12  ;;  %v270_v16 = vcombine.high %v260_v13, %v260_v13 }
  0xb5   : > { %328 = vrot.lane.b32.xlu0 %v1985_v14, %s1790_s9  ;;  %286 = vrot.lane.b32.xlu1 %v1985_v14, %s1791_s10  ;;  %v1997_v17 = vrot.slane %v270_v16, %v276_v12  ;;  %v2007_v19 = vcombine.high %v1985_v14, %v1985_v14 }
  0xb6   : > { %v2061_v26 = vpop.permute.xlu1 %487 }
  0xb9   : > { %350 = vrot.lane.b32.xlu0 %v1985_v14, %s1792_s11  ;;  %306 = vrot.lane.b32.xlu1 %v1985_v14, %s1793_s17 }
  0xba   : > { %v2067_v27 = vpop.permute.xlu1 %509 }
  0xbd   : > { %372 = vrot.lane.b32.xlu0 %v1985_v14, %s1794_s19  ;;  %290 = vrot.lane.b32.xlu1 %v1997_v17, %s1791_s10 }
  0xbe   : > { %v2077_v28 = vpop.permute.xlu1 %531 }
  0xbf   : > { %3075 = vst [vmem:[#allocation11_spill] sm:$0xff] %v2077_v28 }
  0xc1   : > { %394 = vrot.lane.b32.xlu0 %v1985_v14, %s1795_s20  ;;  %308 = vrot.lane.b32.xlu1 %v2007_v19, %s1793_s17 }
  0xc2   : > { %v2083_v29 = vpop.permute.xlu1 %553 }
  0xc3   : > { %3076 = vst [vmem:[#allocation12_spill] sm:$0xff] %v2083_v29 }
  0xc5   : > { %416 = vrot.lane.b32.xlu0 %v1985_v14, %s1796_s24  ;;  %330 = vrot.lane.b32.xlu1 %v2007_v19, %s1790_s9 }
  0xc6   : > { %v2093_v30 = vpop.permute.xlu1 %575 }
  0xc7   : > { %3077 = vst [vmem:[#allocation13_spill] sm:$0xff] %v2093_v30 }
  0xc9   : > { %448 = vrot.lane.b32.xlu0 %v1985_v14, %s1797_s25  ;;  %352 = vrot.lane.b32.xlu1 %v2007_v19, %s1792_s11 }
  0xca   : > { %v2099_v32 = vpop.permute.xlu1 %615 }
  0xcb   : > { %3078 = vst [vmem:[#allocation14_spill] sm:$0xff] %v2099_v32 }
  0xcd   : > { %468 = vrot.lane.b32.xlu0 %v1985_v14, %s1798_s26  ;;  %374 = vrot.lane.b32.xlu1 %v2007_v19, %s1794_s19 }
  0xce   : > { %v2109_v33 = vpop.permute.xlu1 %635 }
  0xcf   : > { %3079 = vst [vmem:[#allocation15_spill] sm:$0xff] %v2109_v33 }
  0xd1   : > { %490 = vrot.lane.b32.xlu0 %v1985_v14, %s3019_s27  ;;  %396 = vrot.lane.b32.xlu1 %v2007_v19, %s1795_s20 }
  0xd2   : > { %v2116_v35 = vpop.permute.xlu1 %657 }
  0xd3   : > { %3080 = vst [vmem:[#allocation16_spill] sm:$0xff] %v2116_v35 }
  0xd5   : > { %512 = vrot.lane.b32.xlu0 %v1985_v14, %s3020_s28  ;;  %418 = vrot.lane.b32.xlu1 %v2007_v19, %s1796_s24 }
  0xd6   : > { %v2127_v37 = vpop.permute.xlu1 %679 }
  0xd7   : > { %3081 = vst [vmem:[#allocation17_spill] sm:$0xff] %v2127_v37 }
  0xd9   : > { %534 = vrot.lane.b32.xlu0 %v1985_v14, %s3021_s29  ;;  %450 = vrot.lane.b32.xlu1 %v2007_v19, %s1797_s25 }
  0xda   : > { %v2136_v39 = vpop.permute.xlu1 %701 }
  0xdb   : > { %3082 = vst [vmem:[#allocation18_spill] sm:$0xff] %v2136_v39 }
  0xdd   : > { %556 = vrot.lane.b32.xlu0 %v1985_v14, %s1802_s30  ;;  %470 = vrot.lane.b32.xlu1 %v2007_v19, %s1798_s26 }
  0xde   : > { %v2144_v40 = vpop.permute.xlu1 %723 }
  0xdf   : > { %3084 = vst [vmem:[#allocation19_spill] sm:$0xff] %v2144_v40  ;;  %v1591_v40 = vld [vmem:[%s3016_s1 + $0x5c] sm:$0x3] }
  0xe1   : > { %578 = vrot.lane.b32.xlu0 %v1985_v14, %s1803_s4  ;;  %492 = vrot.lane.b32.xlu1 %v2007_v19, %s3019_s27  ;;  %s1807_s27 = smov 77  }
  0xe5   : > { %618 = vrot.lane.b32.xlu0 %v1985_v14, %s1804_s5  ;;  %514 = vrot.lane.b32.xlu1 %v2007_v19, %s3020_s28  ;;  %s1808_s28 = smov 61  }
  0xe9   : > { %638 = vrot.lane.b32.xlu0 %v1985_v14, %s1805_s6  ;;  %536 = vrot.lane.b32.xlu1 %v2007_v19, %s3021_s29  ;;  %s3022_s29 = smov 45  }
  0xed   : > { %660 = vrot.lane.b32.xlu0 %v1985_v14, %s1806_s8  ;;  %558 = vrot.lane.b32.xlu1 %v2007_v19, %s1802_s30 }
  0xf1   : > { %682 = vrot.lane.b32.xlu0 %v1985_v14, %s1807_s27  ;;  %580 = vrot.lane.b32.xlu1 %v2007_v19, %s1803_s4 }
  0xf5   : > { %704 = vrot.lane.b32.xlu0 %v1985_v14, %s1808_s28  ;;  %620 = vrot.lane.b32.xlu1 %v2007_v19, %s1804_s5 }
  0xf9   : > { %726 = vrot.lane.b32.xlu0 %v1985_v14, %s3022_s29  ;;  %640 = vrot.lane.b32.xlu1 %v2007_v19, %s1805_s6 }
  0xfd   : > { %288 = vrot.lane.b32.xlu0 %v2007_v19, %s1791_s10  ;;  %662 = vrot.lane.b32.xlu1 %v2007_v19, %s1806_s8 }
 0x101   : > { %310 = vrot.lane.b32.xlu0 %v1997_v17, %s1793_s17  ;;  %684 = vrot.lane.b32.xlu1 %v2007_v19, %s1807_s27  ;;  %s1614_s17 = sshll.u32 %s1881_s16, 7  ;;  %s1839_s16 = smov [#allocation3]  }
 0x105   : > { %332 = vrot.lane.b32.xlu0 %v1997_v17, %s1790_s9  ;;  %706 = vrot.lane.b32.xlu1 %v2007_v19, %s1808_s28  ;;  %s1810_s9 = smov 29  }
 0x109   : > { %354 = vrot.lane.b32.xlu0 %v1997_v17, %s1792_s11  ;;  %728 = vrot.lane.b32.xlu1 %v2007_v19, %s3022_s29  ;;  %s1812_s29 = smov 108   ;;  %s3085_s11 = smov 78  }
 0x10d   : > { %376 = vrot.lane.b32.xlu0 %v1997_v17, %s1794_s19  ;;  %745 = vperm.xlu1 %1708, %v1577_v34   ;;  %s1811_s19 = smov 124  }
 0x111   : > { %398 = vrot.lane.b32.xlu0 %v1997_v17, %s1795_s20  ;;  %750 = vrot.lane.b32.xlu1 %v2007_v19, %s1810_s9  ;;  %s1813_s20 = smov 92  }
 0x115   : > { %420 = vrot.lane.b32.xlu0 %v1997_v17, %s1796_s24  ;;  %783 = vperm.xlu1 %1708, %v1578_v36   ;;  %s3083_s24 = smov 94   ;;  %v1588_v36 = vld [vmem:[%s3016_s1 + $0x32] sm:$0x3] }
 0x119   : > { %452 = vrot.lane.b32.xlu0 %v1997_v17, %s1797_s25  ;;  %788 = vrot.lane.b32.xlu1 %v2007_v19, %s1811_s19  ;;  %s1814_s25 = smov 76  }
 0x11d   : > { %472 = vrot.lane.b32.xlu0 %v1997_v17, %s1798_s26  ;;  %803 = vperm.xlu1 %1708, %v1579_v38   ;;  %s3086_s26 = smov 62  }
 0x121   : > { %494 = vrot.lane.b32.xlu0 %v1997_v17, %s3083_s24  ;;  %808 = vrot.lane.b32.xlu1 %v2007_v19, %s1812_s29 }
 0x125   : > { %516 = vrot.lane.b32.xlu0 %v1997_v17, %s3085_s11  ;;  %825 = vperm.xlu1 %1708, %v1580_v41   ;;  %s1835_s11 = smov 57  }
 0x127   : > { %v2151_v42 = vpop.permute.xlu0 %328  ;;  %v2153_v43 = vpop.permute.xlu1 %286 }
 0x129   : > { %538 = vrot.lane.b32.xlu0 %v1997_v17, %s3086_s26  ;;  %830 = vrot.lane.b32.xlu1 %v2007_v19, %s1813_s20  ;;  %s1838_s26 = smov 25  }
 0x12b   : > { %v2162_v45 = vpop.permute.xlu0 %350  ;;  %v2164_v46 = vpop.permute.xlu1 %306 }
 0x12d   : > { %560 = vrot.lane.b32.xlu0 %v1997_v17, %s1802_s30  ;;  %847 = vperm.xlu1 %1708, %v1581_v44   ;;  %s1815_s30 = smov 60  }
 0x12f   : > { %v2168_v47 = vpop.permute.xlu0 %372  ;;  %v2170_v48 = vpop.permute.xlu1 %290 }
 0x130   : > { %3087 = vst [vmem:[#allocation20_spill] sm:$0xff] %v2170_v48 }
 0x131   : > { %582 = vrot.lane.b32.xlu0 %v1997_v17, %s1803_s4  ;;  %852 = vrot.lane.b32.xlu1 %v2007_v19, %s1814_s25  ;;  %s1836_s4 = smov 26  }
 0x133   : > { %v2179_v50 = vpop.permute.xlu0 %394  ;;  %v2181_v51 = vpop.permute.xlu1 %308 }
 0x135   : > { %622 = vrot.lane.b32.xlu0 %v1997_v17, %s1804_s5  ;;  %869 = vperm.xlu1 %1708, %v1582_v49   ;;  %s1816_s5 = smov 44  }
 0x137   : > { %v2185_v52 = vpop.permute.xlu0 %416  ;;  %v2187_v53 = vpop.permute.xlu1 %330 }
 0x138   : > { %3088 = vst [vmem:[#allocation21_spill] sm:$0xff] %v2185_v52  ;;  %v1596_v52 = vld [vmem:[%s3016_s1 + $0x42] sm:$0x3] }
 0x139   : > { %642 = vrot.lane.b32.xlu0 %v1997_v17, %s1805_s6  ;;  %874 = vrot.lane.b32.xlu1 %v2007_v19, %s1815_s30 }
 0x13b   : > { %v2196_v55 = vpop.permute.xlu0 %448  ;;  %v2198_v56 = vpop.permute.xlu1 %352 }
 0x13d   : > { %664 = vrot.lane.b32.xlu0 %v1997_v17, %s1806_s8  ;;  %891 = vperm.xlu1 %1708, %v1583_v54   ;;  %s1817_s8 = smov 28   ;;  %v1589_v54 = vld [vmem:[%s3016_s1 + $0x40] sm:$0x3] }
 0x13f   : > { %v2202_v57 = vpop.permute.xlu0 %468  ;;  %v2204_v58 = vpop.permute.xlu1 %374 }
 0x141   : > { %686 = vrot.lane.b32.xlu0 %v1997_v17, %s1807_s27  ;;  %896 = vrot.lane.b32.xlu1 %v2007_v19, %s1816_s5  ;;  %s3090_s27 = smov 45  }
 0x143   : > { %v2213_v60 = vpop.permute.xlu0 %490  ;;  %v2215_v61 = vpop.permute.xlu1 %396 }
 0x145   : > { %708 = vrot.lane.b32.xlu0 %v1997_v17, %s1808_s28  ;;  %913 = vperm.xlu1 %1708, %v1584_v59   ;;  %s1818_s28 = smov 123  }
 0x147   : > { %v2219_v62 = vpop.permute.xlu0 %512  ;;  %v2221_v63 = vpop.permute.xlu1 %418 }
 0x148   : > { %3089 = vst [vmem:[#allocation22_spill] sm:$0xff] %v2221_v63 }
 0x149   : > { %730 = vrot.lane.b32.xlu0 %v1997_v17, %s3090_s27  ;;  %918 = vrot.lane.b32.xlu1 %v2007_v19, %s1817_s8 }
 0x14b   : > { %v2230_v1 = vpop.permute.xlu0 %534  ;;  %v2232_v3 = vpop.permute.xlu1 %450 }
 0x14d   : > { %748 = vrot.lane.b32.xlu0 %v1985_v14, %s1810_s9  ;;  %951 = vperm.xlu1 %1708, %v1585_v0  }
 0x14f   : > { %v2236_v4 = vpop.permute.xlu0 %556  ;;  %v2238_v5 = vpop.permute.xlu1 %470 }
 0x150   : > { %3091 = vst [vmem:[#allocation23_spill] sm:$0xff] %v2236_v4 }
 0x151   : > { %752 = vrot.lane.b32.xlu0 %v1997_v17, %s1810_s9  ;;  %956 = vrot.lane.b32.xlu1 %v2007_v19, %s1818_s28  ;;  %s1819_s9 = smov 107  }
 0x153   : > { %v2247_v7 = vpop.permute.xlu0 %578  ;;  %v2249_v8 = vpop.permute.xlu1 %492 }
 0x154   : > { %3092 = vst [vmem:[#allocation24_spill] sm:$0xff] %v2247_v7 }
 0x155   : > { %786 = vrot.lane.b32.xlu0 %v1985_v14, %s1811_s19  ;;  %971 = vperm.xlu1 %1708, %v1586_v6  }
 0x157   : > { %v2253_v9 = vpop.permute.xlu0 %618  ;;  %v2255_v10 = vpop.permute.xlu1 %514 }
 0x158   : > { %3093 = vst [vmem:[#allocation25_spill] sm:$0xff] %v2253_v9  ;;  %v1605_v9 = vld [vmem:[%s3016_s1 + $0x60] sm:$0x3] }
 0x159   : > { %790 = vrot.lane.b32.xlu0 %v1997_v17, %s1811_s19  ;;  %976 = vrot.lane.b32.xlu1 %v2007_v19, %s1819_s9  ;;  %s1820_s19 = smov 91  }
 0x15b   : > { %v2264_v12 = vpop.permute.xlu0 %638  ;;  %v2266_v13 = vpop.permute.xlu1 %536 }
 0x15c   : > { %3094 = vst [vmem:[#allocation26_spill] sm:$0xff] %v2264_v12 }
 0x15d   : > { %806 = vrot.lane.b32.xlu0 %v1985_v14, %s1812_s29  ;;  %993 = vperm.xlu1 %1708, %v1587_v11   ;;  %v1590_v11 = vld [vmem:[%s3016_s1 + $0x4e] sm:$0x3] }
 0x15f   : > { %v2270_v16 = vpop.permute.xlu0 %660  ;;  %v2272_v34 = vpop.permute.xlu1 %558 }
 0x160   : > { %3095 = vst [vmem:[#allocation27_spill] sm:$0xff] %v2270_v16  ;;  %3096 = vst [vmem:[#allocation28_spill] sm:$0xff] %v2272_v34 }
 0x161   : > { %810 = vrot.lane.b32.xlu0 %v1997_v17, %s1812_s29  ;;  %998 = vrot.lane.b32.xlu1 %v2007_v19, %s1820_s19  ;;  %s1821_s29 = smov 75  }
 0x163   : > { %v2281_v38 = vpop.permute.xlu0 %682  ;;  %v2283_v41 = vpop.permute.xlu1 %580 }
 0x164   : > { %3097 = vst [vmem:[#allocation29_spill] sm:$0xff] %v2281_v38  ;;  %3098 = vst [vmem:[#allocation30_spill] sm:$0xff] %v2283_v41 }
 0x165   : > { %828 = vrot.lane.b32.xlu0 %v1985_v14, %s1813_s20  ;;  %1015 = vperm.xlu1 %1708, %v1588_v36  }
 0x167   : > { %v2287_v44 = vpop.permute.xlu0 %704  ;;  %v2293_v49 = vpop.permute.xlu1 %620 }
 0x168   : > { %3099 = vst [vmem:[#allocation31_spill] sm:$0xff] %v2287_v44  ;;  %3100 = vst [vmem:[#allocation32_spill] sm:$0xff] %v2293_v49  ;;  %v1593_v44 = vld [vmem:[%s3016_s1 + $0x18] sm:$0x3] }
 0x169   : > { %832 = vrot.lane.b32.xlu0 %v1997_v17, %s1813_s20  ;;  %1020 = vrot.lane.b32.xlu1 %v2007_v19, %s1821_s29  ;;  %s1822_s20 = smov 59  }
 0x16b   : > { %v2298_v59 = vpop.permute.xlu0 %726  ;;  %v2304_v6 = vpop.permute.xlu1 %640 }
 0x16c   : > { %3101 = vst [vmem:[#allocation33_spill] sm:$0xff] %v2298_v59  ;;  %3102 = vst [vmem:[#allocation34_spill] sm:$0xff] %v2304_v6  ;;  %v1595_v6 = vld [vmem:[%s3016_s1 + $0x34] sm:$0x3] }
 0x16d   : > { %850 = vrot.lane.b32.xlu0 %v1985_v14, %s1814_s25  ;;  %1037 = vperm.xlu1 %1708, %v1589_v54  }
 0x16f   : > { %v2302_v0 = vpop.permute.xlu0 %288  ;;  %v2317_v54 = vpop.permute.xlu1 %662 }
 0x170   : > { %3104 = vst [vmem:[#allocation36_spill] sm:$0xff] %v2317_v54  ;;  %v1599_v54 = vld [vmem:[%s3016_s1 + $0xc] sm:$0x3] }
 0x171   : > { %854 = vrot.lane.b32.xlu0 %v1997_v17, %s1814_s25  ;;  %1042 = vrot.lane.b32.xlu1 %v2007_v19, %s1822_s20  ;;  %s1823_s25 = smov 43  }
 0x173   : > { %v2313_v36 = vpop.permute.xlu0 %310  ;;  %v2330_v39 = vpop.permute.xlu1 %684 }
 0x174   : > { %3103 = vst [vmem:[#allocation35_spill] sm:$0xff] %v2313_v36  ;;  %3107 = vst [vmem:[#allocation39_spill] sm:$0xff] %v2330_v39 }
 0x175   : > { %872 = vrot.lane.b32.xlu0 %v1985_v14, %s1815_s30  ;;  %1059 = vperm.xlu1 %1708, %v1590_v11  }
 0x177   : > { %v2319_v31 = vpop.permute.xlu0 %332  ;;  %v2340_v59 = vpop.permute.xlu1 %706 }
 0x178   : > { %3105 = vst [vmem:[#allocation37_spill] sm:$0xff] %v2319_v31  ;;  %3109 = vst [vmem:[#allocation41_spill] sm:$0xff] %v2340_v59 }
 0x179   : > { %876 = vrot.lane.b32.xlu0 %v1997_v17, %s1815_s30  ;;  %1064 = vrot.lane.b32.xlu1 %v2007_v19, %s1823_s25  ;;  %s1824_s30 = smov 27  }
 0x17b   : > { %v2328_v23 = vpop.permute.xlu0 %354 }
 0x17c   : > { %3106 = vst [vmem:[#allocation38_spill] sm:$0xff] %v2328_v23  ;;  %v1592_v23 = vld [vmem:[%s3016_s1 + $0xa] sm:$0x3] }
 0x17d   : > { %894 = vrot.lane.b32.xlu0 %v1985_v14, %s1816_s5  ;;  %1081 = vperm.xlu1 %1708, %v1591_v40  }
 0x17f   : > { %v2334_v11 = vpop.permute.xlu0 %376 }
 0x180   : > { %3108 = vst [vmem:[#allocation40_spill] sm:$0xff] %v2334_v11  ;;  %v2351_v11 = vpop.permute.xlu1 %728 }
 0x181   : > { %898 = vrot.lane.b32.xlu0 %v1997_v17, %s1816_s5  ;;  %1086 = vrot.lane.b32.xlu1 %v2007_v19, %s1824_s30  ;;  %3112 = vst [vmem:[#allocation44_spill] sm:$0xff] %v2351_v11  ;;  %s1825_s5 = smov 122  }
 0x183   : > { %v2345_v37 = vpop.permute.xlu0 %398 }
 0x184   : > { %3110 = vst [vmem:[#allocation42_spill] sm:$0xff] %v2345_v37 }
 0x185   : > { %916 = vrot.lane.b32.xlu0 %v1985_v14, %s1817_s8  ;;  %1119 = vperm.xlu1 %1708, %v1592_v23  }
 0x187   : > { %v2349_v40 = vpop.permute.xlu0 %420 }
 0x188   : > { %3111 = vst [vmem:[#allocation43_spill] sm:$0xff] %v2349_v40 }
 0x189   : > { %920 = vrot.lane.b32.xlu0 %v1997_v17, %s1817_s8  ;;  %1124 = vrot.lane.b32.xlu1 %v2007_v19, %s1825_s5  ;;  %s1826_s8 = smov 106  }
 0x18b   : > { %v2360_v37 = vpop.permute.xlu0 %452 }
 0x18c   : > { %3113 = vst [vmem:[#allocation45_spill] sm:$0xff] %v2360_v37  ;;  %v2362_v59 = vpop.permute.xlu1 %745  ;;  %v1594_v37 = vld [vmem:[%s3016_s1 + $0x26] sm:$0x3] }
 0x18d   : > { %3114 = vst [vmem:[#allocation46_spill] sm:$0xff] %v2362_v59  ;;  %954 = vrot.lane.b32.xlu0 %v1985_v14, %s1818_s28  ;;  %1139 = vperm.xlu1 %1708, %v1593_v44   ;;  %v1600_v44 = vld [vmem:[%s3016_s1 + $0x1a] sm:$0x3] }
 0x18f   : > { %v2366_v23 = vpop.permute.xlu0 %472 }
 0x190   : > { %3115 = vst [vmem:[#allocation47_spill] sm:$0xff] %v2366_v23  ;;  %v2368_v40 = vpop.permute.xlu1 %750 }
 0x191   : > { %3116 = vst [vmem:[#allocation48_spill] sm:$0xff] %v2368_v40  ;;  %958 = vrot.lane.b32.xlu0 %v1997_v17, %s1818_s28  ;;  %1144 = vrot.lane.b32.xlu1 %v2007_v19, %s1826_s8 }
 0x193   : > { %v2377_v59 = vpop.permute.xlu0 %494 }
 0x194   : > { %3117 = vst [vmem:[#allocation49_spill] sm:$0xff] %v2377_v59  ;;  %v2379_v11 = vpop.permute.xlu1 %783  ;;  %v1601_v59 = vld [vmem:[%s3016_s1 + $0x28] sm:$0x3] }
 0x195   : > { %974 = vrot.lane.b32.xlu0 %v1985_v14, %s1819_s9  ;;  %1161 = vperm.xlu1 %1708, %v1594_v37   ;;  %v1602_v37 = vld [vmem:[%s3016_s1 + $0x36] sm:$0x3] }
 0x197   : > { %v2386_v40 = vpop.permute.xlu0 %516 }
 0x198   : > { %3118 = vst [vmem:[#allocation50_spill] sm:$0xff] %v2386_v40  ;;  %v2388_v23 = vpop.permute.xlu1 %788 }
 0x199   : > { %978 = vrot.lane.b32.xlu0 %v1997_v17, %s1819_s9  ;;  %1307 = vperm.xlu1 %1708, %v1600_v44   ;;  %s1827_s9 = smov 90  }
 0x19b   : > { %v2395_v30 = vpop.permute.xlu0 %538 }
 0x19c   : > { %3119 = vst [vmem:[#allocation51_spill] sm:$0xff] %v2395_v30  ;;  %v2397_v31 = vpop.permute.xlu1 %803 }
 0x19d   : > { %996 = vrot.lane.b32.xlu0 %v1985_v14, %s1820_s19  ;;  %1329 = vperm.xlu1 %1708, %v1601_v59   ;;  %v1597_v59 = vld [vmem:[%s3016_s1 + $0x50] sm:$0x3] }
 0x19f   : > { %v2404_v40 = vpop.permute.xlu0 %560 }
 0x1a0   : > { %3120 = vst [vmem:[#allocation52_spill] sm:$0xff] %v2404_v40  ;;  %v2406_v35 = vpop.permute.xlu1 %808 }
 0x1a1   : > { %1000 = vrot.lane.b32.xlu0 %v1997_v17, %s1820_s19  ;;  %1351 = vperm.xlu1 %1708, %v1602_v37   ;;  %s1828_s19 = smov 121  }
 0x1a3   : > { %v2410_v44 = vpop.permute.xlu0 %582 }
 0x1a4   : > { %3121 = vst [vmem:[#allocation53_spill] sm:$0xff] %v2410_v44  ;;  %v2412_v30 = vpop.permute.xlu1 %825 }
 0x1a5   : > { %1018 = vrot.lane.b32.xlu0 %v1985_v14, %s1821_s29  ;;  %1166 = vrot.lane.b32.xlu1 %v2007_v19, %s1827_s9 }
 0x1a7   : > { %v2421_v40 = vpop.permute.xlu0 %622 }
 0x1a8   : > { %3122 = vst [vmem:[#allocation54_spill] sm:$0xff] %v2421_v40  ;;  %v2423_v38 = vpop.permute.xlu1 %830 }
 0x1a9   : > { %1022 = vrot.lane.b32.xlu0 %v1997_v17, %s1821_s29  ;;  %1227 = vperm.xlu1 %1708, %v1597_v59   ;;  %s1829_s29 = smov 105  }
 0x1ab   : > { %v2427_v37 = vpop.permute.xlu0 %642 }
 0x1ac   : > { %3123 = vst [vmem:[#allocation55_spill] sm:$0xff] %v2427_v37  ;;  %v2429_v44 = vpop.permute.xlu1 %847 }
 0x1ad   : > { %1040 = vrot.lane.b32.xlu0 %v1985_v14, %s1822_s20  ;;  %1292 = vrot.lane.b32.xlu1 %v2007_v19, %s1828_s19 }
 0x1af   : > { %v2435_v39 = vpop.permute.xlu0 %664 }
 0x1b0   : > { %3124 = vst [vmem:[#allocation56_spill] sm:$0xff] %v2435_v39  ;;  %v2437_v40 = vpop.permute.xlu1 %852 }
 0x1b1   : > { %1044 = vrot.lane.b32.xlu0 %v1997_v17, %s1822_s20  ;;  %1310 = vrot.lane.b32.xlu1 %v1985_v14, %s1829_s29  ;;  %s1830_s20 = smov 74  }
 0x1b3   : > { %v2443_v59 = vpop.permute.xlu0 %686 }
 0x1b4   : > { %3125 = vst [vmem:[#allocation57_spill] sm:$0xff] %v2443_v59  ;;  %v2445_v37 = vpop.permute.xlu1 %869 }
 0x1b5   : > { %1062 = vrot.lane.b32.xlu0 %v1985_v14, %s1823_s25  ;;  %1314 = vrot.lane.b32.xlu1 %v1997_v17, %s1829_s29 }
 0x1b7   : > { %v2451_v39 = vpop.permute.xlu0 %708 }
 0x1b8   : > { %3126 = vst [vmem:[#allocation58_spill] sm:$0xff] %v2451_v39  ;;  %v2453_v48 = vpop.permute.xlu1 %874 }
 0x1b9   : > { %1066 = vrot.lane.b32.xlu0 %v1997_v17, %s1823_s25  ;;  %1186 = vrot.lane.b32.xlu1 %v1985_v14, %s1830_s20  ;;  %s1831_s25 = smov 89  }
 0x1bb   : > { %v2459_v59 = vpop.permute.xlu0 %730 }
 0x1bc   : > { %3127 = vst [vmem:[#allocation59_spill] sm:$0xff] %v2459_v59  ;;  %v2461_v32 = vpop.permute.xlu1 %891 }
 0x1bd   : > { %1084 = vrot.lane.b32.xlu0 %v1985_v14, %s1824_s30  ;;  %1190 = vrot.lane.b32.xlu1 %v1997_v17, %s1830_s20 }
 0x1bf   : > { %v2467_v39 = vpop.permute.xlu0 %748 }
 0x1c0   : > { %3128 = vst [vmem:[#allocation60_spill] sm:$0xff] %v2467_v39  ;;  %v2469_v33 = vpop.permute.xlu1 %896 }
 0x1c1   : > { %1088 = vrot.lane.b32.xlu0 %v1997_v17, %s1824_s30  ;;  %1332 = vrot.lane.b32.xlu1 %v1985_v14, %s1831_s25  ;;  %s1832_s30 = smov 58  }
 0x1c3   : > { %v2475_v59 = vpop.permute.xlu0 %752 }
 0x1c4   : > { %3129 = vst [vmem:[#allocation61_spill] sm:$0xff] %v2475_v59  ;;  %v2477_v7 = vpop.permute.xlu1 %913 }
 0x1c5   : > { %1122 = vrot.lane.b32.xlu0 %v1985_v14, %s1825_s5  ;;  %1336 = vrot.lane.b32.xlu1 %v1997_v17, %s1831_s25 }
 0x1c7   : > { %v787_v39 = vpop.permute.xlu0 %786 }
 0x1c8   : > { %v2483_v41 = vpop.permute.xlu1 %918  ;;  %v793_v28 = vsel %vm792_vm8, %v787_v39, %v2388_v23 }
 0x1c9   : > { %1126 = vrot.lane.b32.xlu0 %v1997_v17, %s1825_s5  ;;  %1208 = vrot.lane.b32.xlu1 %v1985_v14, %s1832_s30  ;;  %s1833_s5 = smov 73   ;;  %v797_v39 = vmul.f32 %v793_v28, %v2379_v11 }
 0x1cb   : > { %v791_v29 = vpop.permute.xlu0 %790 }
 0x1cc   : > { %v2489_v59 = vpop.permute.xlu1 %951 }
 0x1cd   : > { %1142 = vrot.lane.b32.xlu0 %v1985_v14, %s1826_s8  ;;  %1212 = vrot.lane.b32.xlu1 %v1997_v17, %s1832_s30 }
 0x1cf   : > { %v807_v36 = vpop.permute.xlu0 %806 }
 0x1d0   : > { %v2495_v16 = vpop.permute.xlu1 %956 }
 0x1d1   : > { %1146 = vrot.lane.b32.xlu0 %v1997_v17, %s1826_s8  ;;  %1356 = vrot.lane.b32.xlu1 %v2007_v19, %s1833_s5  ;;  %s1834_s8 = smov 42  }
 0x1d3   : > { %v811_v49 = vpop.permute.xlu0 %810 }
 0x1d4   : > { %v2507_v12 = vpop.permute.xlu1 %971 }
 0x1d5   : > { %3130 = vst [vmem:[#allocation62_spill] sm:$0xff] %v2507_v12  ;;  %1287 = vperm.xlu0 %1709, %v1599_v54   ;;  %1417 = vperm.xlu1 %1708, %v1605_v9   ;;  %v813_v9 = vsel %vm812_vm7, %v807_v36, %v2406_v35 }
 0x1d7   : > { %v829_v4 = vpop.permute.xlu0 %828 }
 0x1d8   : > { %v2512_v34 = vpop.permute.xlu1 %976  ;;  %v835_v22 = vsel %vm834_vm9, %v829_v4, %v2423_v38  ;;  %v794_v4 = vsel %vm792_vm8, %v2388_v23, %v791_v29  ;;  %vm3061_vm8 = vcmask 252928  }
 0x1d9   : > { %3131 = vst [vmem:[#allocation63_spill] sm:$0xff] %v2512_v34  ;;  %1183 = vperm.xlu0 %1709, %v1595_v6   ;;  %1232 = vrot.lane.b32.xlu1 %v2007_v19, %s1834_s8 }
 0x1db   : > { %v833_v63 = vpop.permute.xlu0 %832 }
 0x1dc   : > { %v2519_v54 = vpop.permute.xlu1 %993 }
 0x1dd   : > { %3132 = vst [vmem:[#allocation64_spill] sm:$0xff] %v2519_v54  ;;  %1205 = vperm.xlu0 %1709, %v1596_v52   ;;  %1376 = vrot.lane.b32.xlu1 %v1985_v14, %s1835_s11  ;;  %v817_v54 = vmul.f32 %v813_v9, %v2397_v31  ;;  %v814_v52 = vsel %vm812_vm7, %v2406_v35, %v811_v49  ;;  %vm3054_vm7 = vcmask 769024  }
 0x1de   : > { %v818_v9 = vmul.f32 %v814_v52, %v2397_v31  ;;  %v836_v35 = vsel %vm834_vm9, %v2423_v38, %v833_v63  ;;  %v798_v31 = vmul.f32 %v794_v4, %v2379_v11  ;;  %vm3056_vm9 = vcmask 637952  }
 0x1df   : > { %v851_v6 = vpop.permute.xlu0 %850  ;;  %v819_v34 = vadd.f32 %v817_v54, %v797_v39  ;;  %v840_v28 = vmul.f32 %v836_v35, %v2412_v30 }
 0x1e0   : > { %v2528_v21 = vpop.permute.xlu1 %998  ;;  %v857_v36 = vsel %vm856_vm10, %v851_v6, %v2437_v40  ;;  %v820_v63 = vadd.f32 %v818_v9, %v798_v31 }
 0x1e1   : > { %3133 = vst [vmem:[#allocation65_spill] sm:$0xff] %v2528_v21  ;;  %1164 = vrot.lane.b32.xlu0 %v1985_v14, %s1827_s9  ;;  %1380 = vrot.lane.b32.xlu1 %v1997_v17, %s1835_s11  ;;  %v839_v21 = vmul.f32 %v835_v22, %v2412_v30  ;;  %v861_v6 = vmul.f32 %v857_v36, %v2429_v44 }
 0x1e3   : > { %v855_v12 = vpop.permute.xlu0 %854  ;;  %v841_v22 = vadd.f32 %v839_v21, %v819_v34  ;;  %v842_v21 = vadd.f32 %v840_v28, %v820_v63 }
 0x1e4   : > { %v858_v49 = vsel %vm856_vm10, %v2437_v40, %v855_v12  ;;  %v2547_v20 = vpop.permute.xlu1 %1015  ;;  %vm540_vm10 = vcmask 506880  }
 0x1e5   : > { %1168 = vrot.lane.b32.xlu0 %v1997_v17, %s1827_s9  ;;  %1254 = vrot.lane.b32.xlu1 %v2007_v19, %s1836_s4  ;;  %v863_v40 = vadd.f32 %v861_v6, %v841_v22  ;;  %v862_v23 = vmul.f32 %v858_v49, %v2429_v44  ;;  %s1837_s9 = smov 41  }
 0x1e7   : > { %v873_v29 = vpop.permute.xlu0 %872  ;;  %v864_v36 = vadd.f32 %v862_v23, %v842_v21 }
 0x1e8   : > { %v879_v12 = vsel %vm878_vm11, %v873_v29, %v2453_v48  ;;  %v2558_v38 = vpop.permute.xlu1 %1020 }
 0x1e9   : > { %v883_v54 = vmul.f32 %v879_v12, %v2445_v37  ;;  %1290 = vrot.lane.b32.xlu0 %v1985_v14, %s1828_s19  ;;  %1398 = vrot.lane.b32.xlu1 %v1985_v14, %s1837_s9 }
 0x1eb   : > { %v885_v30 = vadd.f32 %v883_v54, %v863_v40  ;;  %v877_v34 = vpop.permute.xlu0 %876 }
 0x1ec   : > { %v880_v11 = vsel %vm878_vm11, %v2453_v48, %v877_v34  ;;  %v2568_v52 = vpop.permute.xlu1 %1037  ;;  %v293_v34 = vsel %vm3053_vm14, %v2153_v43, %v2302_v0  ;;  %v475_v43 = vsel %vm3052_vm2, %v2202_v57, %v2238_v5  ;;  %vm562_vm11 = vcmask 375808  }
 0x1ed   : > { %3134 = vst [vmem:[#allocation66_spill] sm:$0xff] %v2568_v52  ;;  %v884_v44 = vmul.f32 %v880_v11, %v2445_v37  ;;  %1294 = vrot.lane.b32.xlu0 %v1997_v17, %s1828_s19  ;;  %1402 = vrot.lane.b32.xlu1 %v1997_v17, %s1837_s9  ;;  %v1603_v37 = vld [vmem:[%s3016_s1 + $0x44] sm:$0x3]  ;;  %v455_v57 = vsel %vm3055_vm6, %v2196_v55, %v2232_v3  ;;  %vm644_vm2 = vcmask 891904   ;;  %vm666_vm14 = vcmask 760832   ;;  %s2973_s19 = scalar_lea.hbm %s3018_s3, %s1614_s17 }
 0x1ee   : > { %v519_v55 = vsel %vm3056_vm9, %v2219_v62, %v2255_v10  ;;  %vm688_vm6 = vcmask 629760   ;;  %v379_v62 = vsel %vm378_vm4, %v2168_v47, %v2204_v58  ;;  %vm732_vm9 = vcmask 367616   ;;  %v3144_v47 = vld [vmem:[#allocation62_spill] sm:$0xff] }
 0x1ef   : > { %v886_v39 = vadd.f32 %v884_v44, %v864_v36  ;;  %v895_v4 = vpop.permute.xlu0 %894 }
 0x1f0   : > { %v901_v9 = vsel %vm900_vm12, %v895_v4, %v2469_v33  ;;  %v2576_v35 = vpop.permute.xlu1 %1042 }
 0x1f1   : > { %3135 = vst [vmem:[#allocation67_spill] sm:$0xff] %v2576_v35  ;;  %v905_v48 = vmul.f32 %v901_v9, %v2461_v32  ;;  %1312 = vrot.lane.b32.xlu0 %v2007_v19, %s1829_s29  ;;  %1422 = vrot.lane.b32.xlu1 %v2007_v19, %s1838_s26 }
 0x1f3   : > { %v907_v49 = vadd.f32 %v905_v48, %v885_v30  ;;  %v899_v6 = vpop.permute.xlu0 %898  ;;  %v497_v48 = vsel %vm3054_vm7, %v2213_v60, %v2249_v8  ;;  %vm980_vm7 = vcmask 875520  }
 0x1f4   : > { %v902_v31 = vsel %vm900_vm12, %v2469_v33, %v899_v6  ;;  %v2587_v22 = vpop.permute.xlu1 %1059  ;;  %v1598_v33 = vld [vmem:[%s3016_s1 + $0x5e] sm:$0x3]  ;;  %vm624_vm12 = vcmask 1022976   ;;  %v479_v6 = vmul.f32 %v475_v43, %v2051_v25 }
 0x1f5   : > { %3136 = vst [vmem:[#allocation68_spill] sm:$0xff] %v2587_v22  ;;  %v906_v28 = vmul.f32 %v902_v31, %v2461_v32  ;;  %1373 = vperm.xlu0 %1709, %v1603_v37  }
 0x1f7   : > { %v908_v29 = vadd.f32 %v906_v28, %v886_v39  ;;  %v917_v63 = vpop.permute.xlu0 %916  ;;  %v297_v39 = vmul.f32 %v293_v34, %v1991_v15  ;;  %v3143_v34 = vld [vmem:[#allocation7_spill] sm:$0xff] }
 0x1f8   : > { %v923_v12 = vsel %vm922_vm13, %v917_v63, %v2483_v41  ;;  %v2591_v40 = vpop.permute.xlu1 %1064  ;;  %v459_v63 = vmul.f32 %v455_v57, %v2045_v24 }
 0x1f9   : > { %3137 = vst [vmem:[#allocation69_spill] sm:$0xff] %v2591_v40  ;;  %v927_v23 = vmul.f32 %v923_v12, %v2477_v7  ;;  %1188 = vrot.lane.b32.xlu0 %v2007_v19, %s1830_s20  ;;  %v501_v12 = vmul.f32 %v497_v48, %v2061_v26 }
 0x1fb   : > { %v2599_v54 = vadd.f32 %v927_v23, %v907_v49  ;;  %v921_v32 = vpop.permute.xlu0 %920  ;;  %v335_v49 = vsel %vm334_vm1, %v2151_v42, %v2187_v53  ;;  %v357_v42 = vsel %vm356_vm3, %v2162_v45, %v2198_v56  ;;  %v541_v23 = vsel %vm540_vm10, %v2230_v1, %v2266_v13  ;;  %v3146_v1 = vld [vmem:[#allocation9_spill] sm:$0xff] }
 0x1fc   : > { %v924_v21 = vsel %vm922_vm13, %v2483_v41, %v921_v32  ;;  %v2606_v11 = vpop.permute.xlu1 %1081  ;;  %vm584_vm13 = vcmask 244736   ;;  %v523_v32 = vmul.f32 %v519_v55, %v2067_v27  ;;  %v3152_v55 = vld [vmem:[#allocation23_spill] sm:$0xff] }
 0x1fd   : > { %3138 = vst [vmem:[#allocation70_spill] sm:$0xff] %v2599_v54  ;;  %v928_v30 = vmul.f32 %v924_v21, %v2477_v7  ;;  %1249 = vperm.xlu0 %1709, %v1598_v33   ;;  %3139 = vst [vmem:[#allocation71_spill] sm:$0xff] %v2606_v11  ;;  %v313_v7 = vsel %vm312_vm15, %v2164_v46, %v2181_v51  ;;  %v1604_v46 = vld [vmem:[%s3016_s1 + $0x52] sm:$0x3]  ;;  %v481_v33 = vadd.f32 %v479_v6, %v459_v63  ;;  %v3142_v21 = vld [vmem:[#allocation63_spill] sm:$0xff] }
 0x1fe   : > { %v317_v9 = vmul.f32 %v313_v7, %v1980_v2  ;;  %v3154_v63 = vld [vmem:[#allocation26_spill] sm:$0xff]  ;;  %v3163_v54 = vld [vmem:[#allocation15_spill] sm:$0xff] }
 0x1ff   : > { %v2608_v36 = vadd.f32 %v928_v30, %v908_v29  ;;  %v955_v44 = vpop.permute.xlu0 %954 }
 0x200   : > { %v961_v41 = vsel %vm960_vm0, %v955_v44, %v2495_v16  ;;  %v2636_v31 = vpop.permute.xlu1 %1086  ;;  %v319_v60 = vadd.f32 %v317_v9, %v297_v39  ;;  %v361_v44 = vmul.f32 %v357_v42, %v3143_v34  ;;  %v3147_v9 = vld [vmem:[#allocation11_spill] sm:$0xff]  ;;  %v3153_v42 = vld [vmem:[#allocation34_spill] sm:$0xff] }
 0x201   : > { %3140 = vst [vmem:[#allocation72_spill] sm:$0xff] %v2608_v36  ;;  %v965_v4 = vmul.f32 %v961_v41, %v2489_v59  ;;  %1334 = vrot.lane.b32.xlu0 %v2007_v19, %s1831_s25  ;;  %3141 = vst [vmem:[#allocation73_spill] sm:$0xff] %v2636_v31  ;;  %v545_v57 = vmul.f32 %v541_v23, %v3147_v9 }
 0x203   : > { %v959_v37 = vpop.permute.xlu0 %958 }
 0x204   : > { %v962_v28 = vsel %vm960_vm0, %v2495_v16, %v959_v37  ;;  %v339_v16 = vmul.f32 %v335_v49, %v1999_v18  ;;  %vm710_vm0 = vcmask 498688   ;;  %v2669_v48 = vpop.permute.xlu1 %1119  ;;  %v3149_v37 = vld [vmem:[#allocation22_spill] sm:$0xff]  ;;  %v3150_v49 = vld [vmem:[#allocation21_spill] sm:$0xff] }
 0x205   : > { %v966_v29 = vmul.f32 %v962_v28, %v2489_v59  ;;  %1395 = vperm.xlu0 %1709, %v1604_v46   ;;  %v401_v59 = vsel %vm400_vm5, %v2179_v50, %v2215_v61  ;;  %v3145_v50 = vld [vmem:[#allocation8_spill] sm:$0xff]  ;;  %v503_v46 = vadd.f32 %v501_v12, %v481_v33  ;;  %3148 = vst [vmem:[#allocation63_spill] sm:$0xff] %v2669_v48  ;;  %v3156_v33 = vld [vmem:[#allocation25_spill] sm:$0xff]  ;;  %v3158_v48 = vld [vmem:[#allocation27_spill] sm:$0xff] }
 0x206   : > { %v341_v7 = vadd.f32 %v339_v16, %v319_v60  ;;  %v383_v43 = vmul.f32 %v379_v62, %v3145_v50  ;;  %v405_v39 = vmul.f32 %v401_v59, %v3146_v1  ;;  %v423_v6 = vsel %vm3061_vm8, %v3150_v49, %v3149_v37  ;;  %v3151_v28 = vld [vmem:[#allocation28_spill] sm:$0xff]  ;;  %v3170_v37 = vld [vmem:[#allocation37_spill] sm:$0xff] }
 0x207   : > { %v975_v45 = vpop.permute.xlu0 %974  ;;  %v563_v60 = vsel %vm562_vm11, %v3152_v55, %v3151_v28  ;;  %v645_v16 = vsel %vm644_vm2, %v3154_v63, %v3153_v42  ;;  %v525_v59 = vadd.f32 %v523_v32, %v503_v46  ;;  %v3155_v12 = vld [vmem:[#allocation32_spill] sm:$0xff]  ;;  %v3159_v55 = vld [vmem:[#allocation35_spill] sm:$0xff]  ;;  %vm1002_vm8 = vcmask 744448   ;;  %v3161_v63 = vld [vmem:[#allocation30_spill] sm:$0xff] }
 0x208   : > { %v981_v30 = vsel %vm980_vm7, %v975_v45, %v3142_v21  ;;  %v625_v23 = vsel %vm624_vm12, %v3156_v33, %v3155_v12  ;;  %v363_v36 = vadd.f32 %v361_v44, %v341_v7  ;;  %v314_v31 = vsel %vm312_vm15, %v2181_v51, %v3159_v55  ;;  %v3162_v33 = vld [vmem:[#allocation24_spill] sm:$0xff]  ;;  %v3164_v44 = vld [vmem:[#allocation14_spill] sm:$0xff] }
 0x209   : > { %v985_v41 = vmul.f32 %v981_v30, %v3144_v47  ;;  %1210 = vrot.lane.b32.xlu0 %v2007_v19, %s1832_s30  ;;  %v3157_v30 = vld [vmem:[#allocation36_spill] sm:$0xff]  ;;  %v547_v32 = vadd.f32 %v545_v57, %v525_v59  ;;  %v629_v7 = vmul.f32 %v625_v23, %v3164_v44  ;;  %vm3166_vm15 = vcmask 1039360   ;;  %v3172_v23 = vld [vmem:[#allocation65_spill] sm:$0xff] }
 0x20a   : > { %v667_v11 = vsel %vm666_vm14, %v3158_v48, %v3157_v30  ;;  %v585_v48 = vsel %vm584_vm13, %v3162_v33, %v3161_v63  ;;  %v3169_v59 = vld [vmem:[#allocation16_spill] sm:$0xff]  ;;  %v318_v40 = vmul.f32 %v314_v31, %v1980_v2  ;;  %v2711_v33 = vpop.permute.xlu1 %1124  ;;  %v385_v52 = vadd.f32 %v383_v43, %v363_v36  ;;  %v3174_v63 = vld [vmem:[#allocation41_spill] sm:$0xff] }
 0x20b   : > { %v987_v62 = vadd.f32 %v985_v41, %v965_v4  ;;  %v979_v45 = vpop.permute.xlu0 %978  ;;  %v3160_v41 = vld [vmem:[#allocation12_spill] sm:$0xff]  ;;  %3171 = vst [vmem:[#allocation7_spill] sm:$0xff] %v2711_v33  ;;  %v3177_v31 = vld [vmem:[#allocation17_spill] sm:$0xff]  ;;  %v3178_v33 = vld [vmem:[#allocation38_spill] sm:$0xff] }
 0x20c   : > { %v982_v49 = vsel %vm980_vm7, %v3142_v21, %v979_v45  ;;  %v567_v46 = vmul.f32 %v563_v60, %v3160_v41  ;;  %v649_v21 = vmul.f32 %v645_v16, %v3163_v54  ;;  %v3165_v45 = vld [vmem:[#allocation20_spill] sm:$0xff]  ;;  %v671_v60 = vmul.f32 %v667_v11, %v3169_v59 }
 0x20d   : > { %v986_v4 = vmul.f32 %v982_v49, %v3144_v47  ;;  %1354 = vrot.lane.b32.xlu0 %v1985_v14, %s1833_s5  ;;  %v294_v51 = vsel %vm3166_vm15, %v2302_v0, %v3165_v45  ;;  %v3167_v47 = vld [vmem:[#allocation39_spill] sm:$0xff]  ;;  %v3168_v49 = vld [vmem:[#allocation29_spill] sm:$0xff]  ;;  %v336_v16 = vsel %vm334_vm1, %v2187_v53, %v3170_v37  ;;  %v3179_v43 = vld [vmem:[#allocation44_spill] sm:$0xff]  ;;  %vm754_vm1 = vcmask 236544  }
 0x20e   : > { %v689_v55 = vsel %vm688_vm6, %v3168_v49, %v3167_v47  ;;  %v3173_v0 = vld [vmem:[#allocation13_spill] sm:$0xff]  ;;  %v3175_v49 = vld [vmem:[#allocation31_spill] sm:$0xff]  ;;  %v651_v2 = vadd.f32 %v649_v21, %v629_v7  ;;  %v298_v53 = vmul.f32 %v294_v51, %v1991_v15  ;;  %v340_v36 = vmul.f32 %v336_v16, %v1999_v18  ;;  %v3181_v21 = vld [vmem:[#allocation18_spill] sm:$0xff]  ;;  %v2742_v16 = vpop.permute.xlu1 %1139 }
 0x20f   : > { %v988_v22 = vadd.f32 %v986_v4, %v966_v29  ;;  %v997_v57 = vpop.permute.xlu0 %996  ;;  %v589_v45 = vmul.f32 %v585_v48, %v3173_v0  ;;  %v711_v29 = vsel %vm710_vm0, %v3175_v49, %v3174_v63  ;;  %v3176_v4 = vld [vmem:[#allocation64_spill] sm:$0xff]  ;;  %v693_v37 = vmul.f32 %v689_v55, %v3177_v31  ;;  %v3180_v0 = vld [vmem:[#allocation33_spill] sm:$0xff]  ;;  %v3182_v18 = vld [vmem:[#allocation10_spill] sm:$0xff] }
 0x210   : > { %v1003_v41 = vsel %vm1002_vm8, %v997_v57, %v3172_v23  ;;  %v358_v57 = vsel %vm356_vm3, %v2198_v56, %v3178_v33  ;;  %v569_v48 = vadd.f32 %v567_v46, %v547_v32  ;;  %v733_v49 = vsel %vm732_vm9, %v3180_v0, %v3179_v43  ;;  %v3183_v55 = vld [vmem:[#allocation19_spill] sm:$0xff] }
 0x211   : > { %v1007_v11 = vmul.f32 %v1003_v41, %v3176_v4  ;;  %1358 = vrot.lane.b32.xlu0 %v1997_v17, %s1833_s5  ;;  %v673_v63 = vadd.f32 %v671_v60, %v651_v2  ;;  %v320_v9 = vadd.f32 %v318_v40, %v298_v53  ;;  %v715_v7 = vmul.f32 %v711_v29, %v3181_v21  ;;  %v3190_v2 = vld [vmem:[#allocation49_spill] sm:$0xff] }
 0x212   : > { %v407_v51 = vadd.f32 %v405_v39, %v385_v52  ;;  %v362_v56 = vmul.f32 %v358_v57, %v3143_v34  ;;  %vm1024_vm3 = vcmask 613376   ;;  %v2739_v46 = vadd.f32 %v589_v45, %v569_v48  ;;  %v3185_v34 = vld [vmem:[#allocation47_spill] sm:$0xff]  ;;  %v3188_v45 = vld [vmem:[#allocation45_spill] sm:$0xff] }
 0x213   : > { %v1009_v41 = vadd.f32 %v1007_v11, %v987_v62  ;;  %v1001_v35 = vpop.permute.xlu0 %1000  ;;  %v427_v62 = vmul.f32 %v423_v6, %v3182_v18  ;;  %v695_v40 = vadd.f32 %v693_v37, %v673_v63  ;;  %v737_v60 = vmul.f32 %v733_v49, %v3183_v55  ;;  %v3187_v6 = vld [vmem:[#allocation42_spill] sm:$0xff]  ;;  %v3192_v37 = vld [vmem:[#allocation55_spill] sm:$0xff] }
 0x214   : > { %v1004_v15 = vsel %vm1002_vm8, %v3172_v23, %v1001_v35  ;;  %v342_v33 = vadd.f32 %v340_v36, %v320_v9  ;;  %v3184_v35 = vld [vmem:[#allocation40_spill] sm:$0xff]  ;;  %vm3186_vm7 = vcmask 900096   ;;  %v402_v63 = vsel %vm400_vm5, %v2215_v61, %v3187_v6  ;;  %v3193_v49 = vld [vmem:[#allocation50_spill] sm:$0xff]  ;;  %v3204_v6 = vld [vmem:[#allocation41_spill] sm:$0xff] }
 0x215   : > { %v1008_v32 = vmul.f32 %v1004_v15, %v3176_v4  ;;  %1230 = vrot.lane.b32.xlu0 %v1985_v14, %s1834_s8  ;;  %v380_v52 = vsel %vm378_vm4, %v2204_v58, %v3184_v35  ;;  %v476_v39 = vsel %vm3186_vm7, %v2238_v5, %v3185_v34  ;;  %v717_v29 = vadd.f32 %v715_v7, %v695_v40 }
 0x216   : > { %vm3189_vm8 = vcmask 1031168   ;;  %v2758_v11 = vadd.f32 %v427_v62, %v407_v51  ;;  %v364_v58 = vadd.f32 %v362_v56, %v342_v33  ;;  %vm3191_vm4 = vcmask 769024   ;;  %v3195_v56 = vld [vmem:[#allocation54_spill] sm:$0xff]  ;;  %v3198_v62 = vld [vmem:[#allocation52_spill] sm:$0xff] }
 0x217   : > { %v1010_v23 = vadd.f32 %v1008_v32, %v988_v22  ;;  %v1019_v0 = vpop.permute.xlu0 %1018  ;;  %v456_v4 = vsel %vm3189_vm8, %v2232_v3, %v3188_v45  ;;  %v498_v5 = vsel %vm3191_vm4, %v2249_v8, %v3190_v2  ;;  %v739_v61 = vadd.f32 %v737_v60, %v717_v29  ;;  %v2783_v32 = vpop.permute.xlu1 %1144  ;;  %v3201_v33 = vld [vmem:[#allocation60_spill] sm:$0xff]  ;;  %v3203_v29 = vld [vmem:[#allocation58_spill] sm:$0xff]  ;;  %v3206_v45 = vld [vmem:[#allocation53_spill] sm:$0xff] }
 0x218   : > { %v1025_v9 = vsel %vm1024_vm3, %v1019_v0, %v2558_v38  ;;  %v384_v53 = vmul.f32 %v380_v52, %v3145_v50  ;;  %v480_v3 = vmul.f32 %v476_v39, %v2051_v25  ;;  %v646_v57 = vsel %vm644_vm2, %v3153_v42, %v3192_v37  ;;  %v3196_v50 = vld [vmem:[#allocation56_spill] sm:$0xff]  ;;  %v3208_v2 = vld [vmem:[#allocation66_spill] sm:$0xff]  ;;  %v3210_v37 = vld [vmem:[#allocation59_spill] sm:$0xff] }
 0x219   : > { %v1029_v22 = vmul.f32 %v1025_v9, %v2547_v20  ;;  %1234 = vrot.lane.b32.xlu0 %v1997_v17, %s1834_s8  ;;  %v406_v48 = vmul.f32 %v402_v63, %v3146_v1  ;;  %v460_v36 = vmul.f32 %v456_v4, %v2045_v24  ;;  %vm3194_vm5 = vcmask 637952   ;;  %v3197_v1 = vld [vmem:[#allocation51_spill] sm:$0xff]  ;;  %s161_s8 = sand.u32 1, %s1775_s13  }
 0x21a   : > { %v520_v8 = vsel %vm3194_vm5, %v2255_v10, %v3193_v49  ;;  %v502_v51 = vmul.f32 %v498_v5, %v2061_v26  ;;  %v626_v25 = vsel %vm624_vm12, %v3155_v12, %v3195_v56  ;;  %v668_v42 = vsel %vm666_vm14, %v3157_v30, %v3196_v50  ;;  %v3205_v63 = vld [vmem:[#allocation67_spill] sm:$0xff]  ;;  %s1555_s24 = sshll.u32 %s161_s8, 3  ;;  %s1478_s6 = scalar_lea.sflag [#allocation4], %s161_s8 }
 0x21b   : > { %v1031_v7 = vadd.f32 %v1029_v22, %v1009_v41  ;;  %v1023_v15 = vpop.permute.xlu0 %1022  ;;  %v542_v10 = vsel %vm540_vm10, %v2266_v13, %v3197_v1  ;;  %v650_v41 = vmul.f32 %v646_v57, %v3163_v54  ;;  %vm1046_vm2 = vcmask 482304   ;;  %v3209_v22 = vld [vmem:[#allocation12_spill] sm:$0xff]  ;;  %v3215_v1 = vld [vmem:[#allocation13_spill] sm:$0xff] }
 0x21c   : > { %v1026_v24 = vsel %vm1024_vm3, %v2558_v38, %v1023_v15  ;;  %v482_v12 = vadd.f32 %v480_v3, %v460_v36  ;;  %v524_v30 = vmul.f32 %v520_v8, %v2067_v27  ;;  %v564_v40 = vsel %vm562_vm11, %v3151_v28, %v3198_v62  ;;  %v3199_v38 = vld [vmem:[#allocation57_spill] sm:$0xff]  ;;  %v3202_v27 = vld [vmem:[#allocation11_spill] sm:$0xff]  ;;  %v3211_v36 = vld [vmem:[#allocation46_spill] sm:$0xff]  ;;  %v2824_v8 = vpop.permute.xlu1 %1161 }
 0x21d   : > { %v1030_v26 = vmul.f32 %v1026_v24, %v2547_v20  ;;  %1378 = vrot.lane.b32.xlu0 %v2007_v19, %s1835_s11  ;;  %v690_v60 = vsel %vm688_vm6, %v3167_v47, %v3199_v38  ;;  %v630_v13 = vmul.f32 %v626_v25, %v3164_v44  ;;  %v672_v54 = vmul.f32 %v668_v42, %v3169_v59  ;;  %v3200_v20 = vld [vmem:[#allocation48_spill] sm:$0xff]  ;;  %v3207_v44 = vld [vmem:[#allocation30_spill] sm:$0xff]  ;;  %v3212_v15 = vld [vmem:[#allocation43_spill] sm:$0xff]  ;;  %s163_s11 = scalar_lea.vmem [#allocation3], %s1555_s24 }
 0x21e   : > { %v755_v35 = vsel %vm754_vm1, %v3201_v33, %v3200_v20  ;;  %v504_v39 = vadd.f32 %v502_v51, %v482_v12  ;;  %v546_v0 = vmul.f32 %v542_v10, %v3202_v27  ;;  %v712_v28 = vsel %vm710_vm0, %v3204_v6, %v3203_v29  ;;  %v3213_v51 = vld [vmem:[#allocation22_spill] sm:$0xff] }
 0x21f   : > { %v1032_v52 = vadd.f32 %v1030_v26, %v1010_v23  ;;  %v1041_v34 = vpop.permute.xlu0 %1040  ;;  %v586_v59 = vsel %vm584_vm13, %v3207_v44, %v3206_v45  ;;  %v652_v4 = vadd.f32 %v650_v41, %v630_v13  ;;  %v694_v9 = vmul.f32 %v690_v60, %v3177_v31  ;;  %v3216_v41 = vld [vmem:[#allocation61_spill] sm:$0xff]  ;;  %v3219_v45 = vld [vmem:[#allocation70_spill] sm:$0xff] }
 0x220   : > { %v1047_v47 = vsel %vm1046_vm2, %v1041_v34, %v3205_v63  ;;  %v526_v5 = vadd.f32 %v524_v30, %v504_v39  ;;  %v568_v3 = vmul.f32 %v564_v40, %v3209_v22  ;;  %v734_v57 = vsel %vm732_vm9, %v3179_v43, %v3210_v37  ;;  %v2843_v34 = vpop.permute.xlu1 %1307  ;;  %v3217_v39 = vld [vmem:[#allocation69_spill] sm:$0xff] }
 0x221   : > { %v1051_v23 = vmul.f32 %v1047_v47, %v3208_v2  ;;  %1252 = vrot.lane.b32.xlu0 %v1985_v14, %s1836_s4  ;;  %v759_v49 = vmul.f32 %v755_v35, %v3211_v36  ;;  %vm3214_vm14 = vcmask 252928   ;;  %v674_v56 = vadd.f32 %v672_v54, %v652_v4 }
 0x222   : > { %v424_v31 = vsel %vm3214_vm14, %v3213_v51, %v3212_v15  ;;  %v716_v25 = vmul.f32 %v712_v28, %v3181_v21  ;;  %v548_v24 = vadd.f32 %v546_v0, %v526_v5  ;;  %v590_v10 = vmul.f32 %v586_v59, %v3215_v1  ;;  %v3220_v51 = vld [vmem:[#allocation73_spill] sm:$0xff] }
 0x223   : > { %v1053_v50 = vadd.f32 %v1051_v23, %v1031_v7  ;;  %v1045_v42 = vpop.permute.xlu0 %1044  ;;  %v756_v43 = vsel %vm754_vm1, %v3200_v20, %v3216_v41  ;;  %v696_v12 = vadd.f32 %v694_v9, %v674_v56  ;;  %v738_v30 = vmul.f32 %v734_v57, %v3183_v55 }
 0x224   : > { %v1048_v26 = vsel %vm1046_vm2, %v3205_v63, %v1045_v42  ;;  %vm1068_vm6 = vcmask 351232   ;;  %v386_v21 = vadd.f32 %v384_v53, %v364_v58  ;;  %v428_v7 = vmul.f32 %v424_v31, %v3182_v18  ;;  %v3218_v18 = vld [vmem:[#allocation68_spill] sm:$0xff]  ;;  %v2871_v22 = vpop.permute.xlu1 %1329  ;;  %v3222_v42 = vld [vmem:[#allocation71_spill] sm:$0xff] }
 0x225   : > { %v1052_v62 = vmul.f32 %v1048_v26, %v3208_v2  ;;  %1256 = vrot.lane.b32.xlu0 %v1997_v17, %s1836_s4  ;;  %v570_v40 = vadd.f32 %v568_v3, %v548_v24  ;;  %v761_v38 = vadd.f32 %v759_v49, %v739_v61  ;;  %v433_v60 = vrot.slane %v2758_v11, 1  ;;  %v2854_v61 = vld [vmem:[%s3015_s0] sm:$0x7f]  ;;  %s1492_s4 = sshll.u32 %s163_s11, 4  ;;  %s2975_s4 = int_to_ptr.vmem [resolvable:$true] %s1492_s4 }
 0x226   : > { %v718_v13 = vadd.f32 %v716_v25, %v696_v12  ;;  %v760_v54 = vmul.f32 %v756_v43, %v3211_v36  ;;  %v408_v35 = vadd.f32 %v406_v48, %v386_v21  ;;  %v595_v58 = vrot.slane %v2739_v46, 1  ;;  %v3221_v25 = vld [vmem:[#allocation72_spill] sm:$0xff]  ;;  %s1721_s29 = scalar_lea.vmem %s2975_s4, 128 }
 0x227   : > { %v1054_v20 = vadd.f32 %v1052_v62, %v1032_v52  ;;  %v1063_v33 = vpop.permute.xlu0 %1062  ;;  %v592_v55 = vadd.f32 %v590_v10, %v570_v40  ;;  %v765_v52 = vrot.slane %v761_v38, 1  ;;  %v437_v29 = vadd.f32 %v433_v60, %v2758_v11  ;;  %v2868_v11 = vld [vmem:[%s3015_s0 + $0x8] sm:$0x7f]  ;;  %p1722_p11 = scmp.ne.s32.totalorder %s2975_s4, %s1721_s29 }
 0x228   : > { %v1069_v27 = vsel %vm1068_vm6, %v1063_v33, %v3217_v39  ;;  %v740_v53 = vadd.f32 %v738_v30, %v718_v13  ;;  %v430_v48 = vadd.f32 %v428_v7, %v408_v35  ;;  %v933_v44 = vrot.slane %v3219_v45, 1  ;;  %v2885_v40 = vpop.permute.xlu1 %1351 }
 0x229   : > { %v1073_v0 = vmul.f32 %v1069_v27, %v3218_v18  ;;  %1400 = vrot.lane.b32.xlu0 %v2007_v19, %s1837_s9  ;;  %v596_v47 = vrot.slane %v592_v55, 1  ;;  %v603_v19 = vrot.slane %v2854_v61, 1  ;;  %v599_v4 = vadd.f32 %v595_v58, %v2739_v46  ;;  %p1723_p12 = pnand %p1722_p11, %p1898_p5 }
 0x22a   : > { %v762_v6 = vadd.f32 %v760_v54, %v740_v53  ;;  %vm1090_vm9 = vcmask 220160   ;;  %v434_v2 = vrot.slane %v430_v48, 1  ;;  %v771_v23 = vrot.slane %v2854_v61, 2 }
 0x22b   : > { %v1075_v28 = vadd.f32 %v1073_v0, %v1053_v50  ;;  %v1067_v63 = vpop.permute.xlu0 %1066  ;;  %v769_v5 = vadd.f32 %v765_v52, %v761_v38  ;;  %v604_v3 = vrot.slane %v2868_v11, 1  ;;  %v439_v46 = vmul.f32 %v437_v29, %v2854_v61  ;;  %v3223_v0 = vld [vmem:[#allocation7_spill] sm:$0xff]  ;;  %p1724_p13 = pneg %p1723_p12 }
 0x22c   : > { %v1070_v59 = vsel %vm1068_vm6, %v3217_v39, %v1067_v63  ;;  %v766_v37 = vrot.slane %v762_v6, 1  ;;  %v939_v49 = vrot.slane %v2854_v61, 3  ;;  %v937_v15 = vadd.f32 %v933_v44, %v3219_v45 }
 0x22d   : > { %v1074_v9 = vmul.f32 %v1070_v59, %v3218_v18  ;;  %1420 = vrot.lane.b32.xlu0 %v1985_v14, %s1838_s26  ;;  %v600_v14 = vadd.f32 %v596_v47, %v592_v55  ;;  %v607_v56 = vmul.f32 %v603_v19, %v599_v4  ;;  %v934_v50 = vrot.slane %v3221_v25, 1  ;;  %v1167_v47 = vpop.permute.xlu1 %1166 }
 0x22e   : > { %v438_v1 = vadd.f32 %v434_v2, %v430_v48  ;;  %v775_v10 = vmul.f32 %v771_v23, %v769_v5  ;;  %v772_v41 = vrot.slane %v2868_v11, 2  ;;  %v770_v26 = vadd.f32 %v766_v37, %v762_v6 }
 0x22f   : > { %v1076_v57 = vadd.f32 %v1074_v9, %v1054_v20  ;;  %v1085_v36 = vpop.permute.xlu0 %1084  ;;  %v609_v43 = vadd.f32 %v607_v56, %v439_v46  ;;  %v940_v12 = vrot.slane %v2868_v11, 3  ;;  %v608_v21 = vmul.f32 %v604_v3, %v600_v14 }
 0x230   : > { %v1091_v31 = vsel %vm1090_vm9, %v1085_v36, %v3220_v51  ;;  %v943_v7 = vmul.f32 %v939_v49, %v937_v15  ;;  %v1107_v38 = vrot.slane %v2854_v61, 4  ;;  %vm1128_vm10 = vcmask 998400  }
 0x231   : > { %v1095_v24 = vmul.f32 %v1091_v31, %v3222_v42  ;;  %1424 = vrot.lane.b32.xlu0 %v1997_v17, %s1838_s26  ;;  %v938_v17 = vadd.f32 %v934_v50, %v3221_v25  ;;  %v440_v20 = vmul.f32 %v438_v1, %v2868_v11  ;;  %v777_v33 = vadd.f32 %v775_v10, %v609_v43  ;;  %v2904_v46 = vpop.permute.xlu1 %1227 }
 0x232   : > { %v776_v35 = vmul.f32 %v772_v41, %v770_v26  ;;  %v1108_v18 = vrot.slane %v2868_v11, 4  ;;  %vm1148_vm11 = vcmask 867328   ;;  %vm1170_vm12 = vcmask 736256  }
 0x233   : > { %v1097_v30 = vadd.f32 %v1095_v24, %v1075_v28  ;;  %v1089_v62 = vpop.permute.xlu0 %1088  ;;  %v610_v58 = vadd.f32 %v608_v21, %v440_v20  ;;  %v945_v53 = vadd.f32 %v943_v7, %v777_v33  ;;  %v944_v52 = vmul.f32 %v940_v12, %v938_v17  ;;  %v3224_v28 = vld [vmem:[#allocation63_spill] sm:$0xff] }
 0x234   : > { %v1092_v60 = vsel %vm1090_vm9, %v3220_v51, %v1089_v62  ;;  %vm1192_vm13 = vcmask 605184   ;;  %vm1214_vm0 = vcmask 474112   ;;  %vm1236_vm15 = vcmask 343040  }
 0x235   : > { %v1101_v13 = vrot.slane %v1097_v30, 1  ;;  %v1096_v54 = vmul.f32 %v1092_v60, %v3222_v42  ;;  %v778_v45 = vadd.f32 %v776_v35, %v610_v58  ;;  %v2910_v51 = vpop.permute.xlu1 %1292  ;;  %vm1316_vm1 = vcmask 859136  }
 0x236   : > { %vm1296_vm3 = vcmask 990208   ;;  %vm1338_vm7 = vcmask 728064   ;;  %vm1258_vm8 = vcmask 211968   ;;  %vm1360_vm4 = vcmask 596992  }
 0x237   : > { %v1105_v55 = vadd.f32 %v1101_v13, %v1097_v30  ;;  %v1098_v39 = vadd.f32 %v1096_v54, %v1076_v57  ;;  %v1123_v27 = vpop.permute.xlu0 %1122  ;;  %v946_v9 = vadd.f32 %v944_v52, %v778_v45  ;;  %vm1382_vm5 = vcmask 465920  }
 0x238   : > { %v1129_v48 = vsel %vm1128_vm10, %v1123_v27, %v3223_v0  ;;  %vm1404_vm2 = vcmask 334848   ;;  %vm1426_vm14 = vcmask 203776  }
 0x239   : > { %v1111_v29 = vmul.f32 %v1107_v38, %v1105_v55  ;;  %v1102_v6 = vrot.slane %v1098_v39, 1  ;;  %v1133_v63 = vmul.f32 %v1129_v48, %v3224_v28  ;;  %v1311_v56 = vpop.permute.xlu1 %1310 }
 0x23b   : > { %v2897_v44 = vadd.f32 %v1111_v29, %v945_v53  ;;  %v1106_v59 = vadd.f32 %v1102_v6, %v1098_v39  ;;  %v1127_v19 = vpop.permute.xlu0 %1126 }
 0x23c   : > { %v1130_v4 = vsel %vm1128_vm10, %v3223_v0, %v1127_v19 }
 0x23d   : > { %v1112_v2 = vmul.f32 %v1108_v18, %v1106_v59  ;;  %v1134_v23 = vmul.f32 %v1130_v4, %v3224_v28  ;;  %v2912_v25 = vpop.permute.xlu1 %1314 }
 0x23f   : > { %v2902_v5 = vadd.f32 %v1112_v2, %v946_v9  ;;  %v1143_v3 = vpop.permute.xlu0 %1142 }
 0x240   : > { %v1149_v37 = vsel %vm1148_vm11, %v1143_v3, %v2783_v32 }
 0x241   : > { %v1153_v57 = vmul.f32 %v1149_v37, %v2742_v16  ;;  %v1187_v42 = vpop.permute.xlu1 %1186 }
 0x243   : > { %v1155_v36 = vadd.f32 %v1153_v57, %v1133_v63  ;;  %v1147_v14 = vpop.permute.xlu0 %1146 }
 0x244   : > { %v1150_v49 = vsel %vm1148_vm11, %v2783_v32, %v1147_v14 }
 0x245   : > { %v1154_v15 = vmul.f32 %v1150_v49, %v2742_v16  ;;  %v1191_v10 = vpop.permute.xlu1 %1190 }
 0x247   : > { %v1156_v31 = vadd.f32 %v1154_v15, %v1134_v23 }
 0x249   : > { %v1333_v32 = vpop.permute.xlu1 %1332 }
 0x24d   : > { %v2918_v38 = vpop.permute.xlu1 %1336 }
 0x251   : > { %v1209_v17 = vpop.permute.xlu1 %1208 }
 0x254   : > { %v2914_v50 = vpop.permute.xlu0 %1287 }
 0x255   : > { %v1213_v20 = vpop.permute.xlu1 %1212 }
 0x258   : > { %v1184_v24 = vpop.permute.xlu0 %1183 }
 0x259   : > { %v1357_v58 = vpop.permute.xlu1 %1356 }
 0x25c   : > { %v1206_v1 = vpop.permute.xlu0 %1205 }
 0x25d   : > { %v2922_v48 = vpop.permute.xlu1 %1417 }
 0x260   : > { %v1165_v41 = vpop.permute.xlu0 %1164 }
 0x261   : > { %v1171_v43 = vsel %vm1170_vm12, %v1165_v41, %v1167_v47  ;;  %v1233_v29 = vpop.permute.xlu1 %1232 }
 0x262   : > { %v1175_v26 = vmul.f32 %v1171_v43, %v2824_v8 }
 0x264   : > { %v1177_v12 = vadd.f32 %v1175_v26, %v1155_v36  ;;  %v1169_v16 = vpop.permute.xlu0 %1168 }
 0x265   : > { %v1172_v30 = vsel %vm1170_vm12, %v1167_v47, %v1169_v16  ;;  %v1377_v9 = vpop.permute.xlu1 %1376 }
 0x266   : > { %v1176_v62 = vmul.f32 %v1172_v30, %v2824_v8 }
 0x268   : > { %v1178_v21 = vadd.f32 %v1176_v62, %v1156_v31  ;;  %v1291_v7 = vpop.permute.xlu0 %1290 }
 0x269   : > { %v1381_v23 = vpop.permute.xlu1 %1380 }
 0x26c   : > { %v1295_v60 = vpop.permute.xlu0 %1294 }
 0x26d   : > { %v1255_v57 = vpop.permute.xlu1 %1254 }
 0x270   : > { %v1313_v13 = vpop.permute.xlu0 %1312 }
 0x271   : > { %v1317_v49 = vsel %vm1316_vm1, %v1311_v56, %v1313_v13 }
 0x272   : > { %v1321_v41 = vmul.f32 %v1317_v49, %v2843_v34 }
 0x274   : > { %v2920_v54 = vpop.permute.xlu0 %1373 }
 0x278   : > { %v1189_v33 = vpop.permute.xlu0 %1188 }
 0x279   : > { %v1193_v35 = vsel %vm1192_vm13, %v1187_v42, %v1189_v33  ;;  %v1194_v55 = vsel %vm1192_vm13, %v1189_v33, %v1191_v10  ;;  %v1297_v42 = vsel %vm1296_vm3, %v1291_v7, %v2910_v51  ;;  %v1318_v10 = vsel %vm1316_vm1, %v1313_v13, %v2912_v25 }
 0x27a   : > { %v1197_v39 = vmul.f32 %v1193_v35, %v1184_v24  ;;  %v1198_v27 = vmul.f32 %v1194_v55, %v1184_v24  ;;  %v1399_v24 = vpop.permute.xlu1 %1398  ;;  %v1301_v62 = vmul.f32 %v1297_v42, %v2914_v50  ;;  %v1275_v7 = vrot.slane %v2854_v61, 5 }
 0x27b   : > { %v1322_v25 = vmul.f32 %v1318_v10, %v2843_v34 }
 0x27c   : > { %v1199_v53 = vadd.f32 %v1197_v39, %v1177_v12  ;;  %v1200_v18 = vadd.f32 %v1198_v27, %v1178_v21  ;;  %v1250_v8 = vpop.permute.xlu0 %1249  ;;  %v1298_v21 = vsel %vm1296_vm3, %v2910_v51, %v1295_v60  ;;  %v1323_v33 = vadd.f32 %v1321_v41, %v1301_v62 }
 0x27e   : > { %v1403_v51 = vpop.permute.xlu1 %1402 }
 0x280   : > { %v1335_v0 = vpop.permute.xlu0 %1334 }
 0x281   : > { %v1339_v43 = vsel %vm1338_vm7, %v1333_v32, %v1335_v0  ;;  %v1340_v32 = vsel %vm1338_vm7, %v1335_v0, %v2918_v38 }
 0x282   : > { %v1344_v38 = vmul.f32 %v1340_v32, %v2871_v22 }
 0x284   : > { %v2924_v52 = vpop.permute.xlu0 %1395 }
 0x288   : > { %v1211_v6 = vpop.permute.xlu0 %1210 }
 0x289   : > { %v1215_v28 = vsel %vm1214_vm0, %v1209_v17, %v1211_v6  ;;  %v1216_v63 = vsel %vm1214_vm0, %v1211_v6, %v1213_v20  ;;  %v1343_v17 = vmul.f32 %v1339_v43, %v2871_v22 }
 0x28a   : > { %v1219_v47 = vmul.f32 %v1215_v28, %v1206_v1  ;;  %v1220_v45 = vmul.f32 %v1216_v63, %v1206_v1 }
 0x28b   : > { %v1345_v0 = vadd.f32 %v1343_v17, %v1323_v33 }
 0x28c   : > { %v1221_v59 = vadd.f32 %v1219_v47, %v1199_v53  ;;  %v1222_v19 = vadd.f32 %v1220_v45, %v1200_v18  ;;  %v1355_v4 = vpop.permute.xlu0 %1354  ;;  %v1302_v53 = vmul.f32 %v1298_v21, %v2914_v50  ;;  %v1276_v18 = vrot.slane %v2868_v11, 5 }
 0x28d   : > { %v1361_v26 = vsel %vm1360_vm4, %v1355_v4, %v1357_v58 }
 0x28e   : > { %v1324_v47 = vadd.f32 %v1322_v25, %v1302_v53 }
 0x290   : > { %v1359_v2 = vpop.permute.xlu0 %1358  ;;  %v1346_v4 = vadd.f32 %v1344_v38, %v1324_v47 }
 0x291   : > { %v1362_v60 = vsel %vm1360_vm4, %v1357_v58, %v1359_v2  ;;  %v1423_v2 = vpop.permute.xlu1 %1422 }
 0x292   : > { %v1366_v45 = vmul.f32 %v1362_v60, %v2885_v40 }
 0x294   : > { %v1231_v3 = vpop.permute.xlu0 %1230  ;;  %v1368_v49 = vadd.f32 %v1366_v45, %v1346_v4 }
 0x295   : > { %v1237_v36 = vsel %vm1236_vm15, %v1231_v3, %v1233_v29 }
 0x296   : > { %v1241_v15 = vmul.f32 %v1237_v36, %v2904_v46 }
 0x298   : > { %v1235_v37 = vpop.permute.xlu0 %1234  ;;  %v1243_v12 = vadd.f32 %v1241_v15, %v1221_v59 }
 0x299   : > { %v1238_v31 = vsel %vm1236_vm15, %v1233_v29, %v1235_v37 }
 0x29a   : > { %v1242_v16 = vmul.f32 %v1238_v31, %v2904_v46  ;;  %v1365_v46 = vmul.f32 %v1361_v26, %v2885_v40 }
 0x29c   : > { %v1379_v14 = vpop.permute.xlu0 %1378  ;;  %v1244_v39 = vadd.f32 %v1242_v16, %v1222_v19  ;;  %v1367_v59 = vadd.f32 %v1365_v46, %v1345_v0 }
 0x29d   : > { %v1383_v35 = vsel %vm1382_vm5, %v1377_v9, %v1379_v14  ;;  %v1384_v58 = vsel %vm1382_vm5, %v1379_v14, %v1381_v23 }
 0x29e   : > { %v1387_v29 = vmul.f32 %v1383_v35, %v2920_v54  ;;  %v1388_v3 = vmul.f32 %v1384_v58, %v2920_v54 }
 0x2a0   : > { %v1253_v1 = vpop.permute.xlu0 %1252  ;;  %v1389_v37 = vadd.f32 %v1387_v29, %v1367_v59 }
 0x2a1   : > { %v1259_v56 = vsel %vm1258_vm8, %v1253_v1, %v1255_v57 }
 0x2a2   : > { %v1263_v30 = vmul.f32 %v1259_v56, %v1250_v8 }
 0x2a4   : > { %v1265_v13 = vadd.f32 %v1263_v30, %v1243_v12  ;;  %v1257_v20 = vpop.permute.xlu0 %1256 }
 0x2a5   : > { %v1260_v55 = vsel %vm1258_vm8, %v1255_v57, %v1257_v20 }
 0x2a6   : > { %v1269_v27 = vrot.slane %v1265_v13, 1  ;;  %v1264_v34 = vmul.f32 %v1260_v55, %v1250_v8 }
 0x2a8   : > { %v1273_v6 = vadd.f32 %v1269_v27, %v1265_v13  ;;  %v1266_v28 = vadd.f32 %v1264_v34, %v1244_v39  ;;  %v1401_v63 = vpop.permute.xlu0 %1400  ;;  %v1720_v39 = vld [vmem:[%s1922_s7] sm:$0xff]  ;;  %s1725_s7 = sshll.u32 %s1839_s16, 4  ;;  %s1726_s7 = int_to_ptr.vmem [resolvable:$false] %s1725_s7 }
 0x2a9   : > { %v1405_v8 = vsel %vm1404_vm2, %v1399_v24, %v1401_v63  ;;  %v1406_v9 = vsel %vm1404_vm2, %v1401_v63, %v1403_v51  ;;  %v1390_v24 = vadd.f32 %v1388_v3, %v1368_v49  ;;  %s1727_s28 = scalar_lea.vmem %s1726_s7, 256  ;;  %p1728_p0 = scmp.lt.s32.totalorder %s2975_s4, %s1726_s7 }
 0x2aa   : > { %v1279_v50 = vmul.f32 %v1275_v7, %v1273_v6  ;;  %v1270_v19 = vrot.slane %v1266_v28, 1  ;;  %v1409_v22 = vmul.f32 %v1405_v8, %v2924_v52  ;;  %v1410_v15 = vmul.f32 %v1406_v9, %v2924_v52  ;;  %p1729_p1 = scmp.lt.s32.totalorder %s1727_s28, %s1721_s29 }
 0x2ab   : > { %v1444_v52 = vrot.slane %v2868_v11, 6  ;;  %v3225_v11 = vld [vmem:[#allocation6_spill] sm:$0xff] }
 0x2ac   : > { %v1281_v57 = vadd.f32 %v1279_v50, %v2897_v44  ;;  %v1274_v36 = vadd.f32 %v1270_v19, %v1266_v28  ;;  %v1421_v40 = vpop.permute.xlu0 %1420  ;;  %v1411_v31 = vadd.f32 %v1409_v22, %v1389_v37  ;;  %v1412_v43 = vadd.f32 %v1410_v15, %v1390_v24  ;;  %p1730_p2 = por %p1729_p1, %p1728_p0 }
 0x2ad   : > { %v1427_v23 = vsel %vm1426_vm14, %v1421_v40, %v1423_v2  ;;  %v1443_v44 = vrot.slane %v2854_v61, 6  ;;  %v1465_v33 = vsub.s32 0, %v3225_v11 }
 0x2ae   : > { %v1280_v14 = vmul.f32 %v1276_v18, %v1274_v36  ;;  %v1431_v42 = vmul.f32 %v1427_v23, %v2922_v48  ;;  %p1731_p3 = pnand %p1730_p2, %p1724_p13 }
 0x2b0   : > { %v1282_v1 = vadd.f32 %v1280_v14, %v2902_v5  ;;  %v1433_v10 = vadd.f32 %v1431_v42, %v1411_v31  ;;  %v1425_v41 = vpop.permute.xlu0 %1424 }
 0x2b1   : > { %v1428_v54 = vsel %vm1426_vm14, %v1423_v2, %v1425_v41 }
 0x2b2   : > { %v1437_v56 = vrot.slane %v1433_v10, 1  ;;  %v1432_v26 = vmul.f32 %v1428_v54, %v2922_v48 }
 0x2b4   : > { %v1441_v12 = vadd.f32 %v1437_v56, %v1433_v10  ;;  %v1434_v16 = vadd.f32 %v1432_v26, %v1412_v43 }
 0x2b6   : > { %v1447_v30 = vmul.f32 %v1443_v44, %v1441_v12  ;;  %v1438_v62 = vrot.slane %v1434_v16, 1 }
 0x2b8   : > { %v1449_v21 = vadd.f32 %v1447_v30, %v1281_v57  ;;  %v1442_v7 = vadd.f32 %v1438_v62, %v1434_v16 }
 0x2ba   : > { %v1606_v5 = vmul.f32 -1.442695, %v1449_v21  ;;  %v1448_v25 = vmul.f32 %v1444_v52, %v1442_v7 }
 0x2bc   : > { %1712 = vpow2.f32 %v1606_v5  ;;  %v1450_v32 = vadd.f32 %v1448_v25, %v1282_v1 }
 0x2be   : > { %v1607_v17 = vmul.f32 -1.442695, %v1450_v32 }
 0x2c0   : > { %1714 = vpow2.f32 %v1607_v17 }
 0x2c6   : > { %v1713_v61 = vpop.eup %1712 }
 0x2c7   : > { %v1457_v13 = vadd.f32 1.0, %v1713_v61 }
 0x2c9   : > { %1716 = vrcp.f32 %v1457_v13 }
 0x2ca   : > { %v1715_v48 = vpop.eup %1714 }
 0x2cb   : > { %v1458_v20 = vadd.f32 1.0, %v1715_v48 }
 0x2cd   : > { %1718 = vrcp.f32 %v1458_v20 }
 0x2d3   : > { %v1717_v46 = vpop.eup %1716 }
 0x2d4   : > { %v1466_v55 = vrot.slane %v1717_v46, %v1465_v33 }
 0x2d7   : > { %v1719_v35 = vpop.eup %1718 }
 0x2d8   : > { %v1470_v51 = vrot.slane %v1719_v35, %v1465_v33 }
 0x2da   : > { %v1473_v60 = vcombine.low %v1466_v55, %v1470_v51 }
 0x2dc   : > { %v1475_v27 = vmul.f32 %v1720_v39, %v1473_v60 }
 0x2de   : > { %1476 = vst [vmem:[%s163_s11] sm:$0xff] %v1475_v27 }
 0x2df   : > { %1734 = shalt.err (!%p1731_p3)
}
 0x2e0   : > { %s1735_s20 = scalar_lea.hbm %s2973_s19, 128  ;;  %s1739_s30 = scalar_lea.hbm %s3018_s3, 256 }
 0x2e1   : > { %p1736_p4 = scmp.ne.s32.totalorder %s2973_s19, %s1735_s20  ;;  %p1740_p9 = scmp.lt.u32.totalorder %s2973_s19, %s3018_s3 }
 0x2e2   : > { %p1741_p10 = scmp.lt.u32.totalorder %s1739_s30, %s1735_s20  ;;  %p1743_p12 = scmp.lt.u32.totalorder %s1735_s20, %s2973_s19 }
 0x2e3   : > { %p1737_p7 = pnand %p1736_p4, %p1898_p5 }
 0x2e4   : > { %p1742_p11 = por %p1741_p10, %p1740_p9 }
 0x2e5   : > { %p1738_p8 = pneg %p1737_p7 }
 0x2e6   : > { %p1744_p13 = por %p1743_p12, %p1742_p11 }
 0x2e8   : > { %p1745_p0 = pnand %p1744_p13, %p1738_p8 }
 0x2ea   : > { %1748 = shalt.err (!%p1745_p0)
}
 0x2eb   : > { %1615 = dma.vmem_to_hbm [thread:$0]  (%p1898_p5), %s2975_s4, 128, %s2973_s19, %s1478_s6  }
 0x2ec PF: > { %p1621_p1 = scmp.ge.s32.totalorder %s1783_s15, 2  ;;  %s1504_s8 = sand.u32 1, %s1771_s12  }
 0x2ed   : > { %s1505_s24 = scalar_lea.sflag [#allocation4], %s1504_s8 }
 0x2ee   : > { %p1618_p2 = pnand %p1621_p1, %p1902_p6 }
 0x2f0   : > { %1766 = dma.done.wait (!%p1618_p2), %s1505_s24, 128  }
 0x2f1   : > { %1768 = vsyncadd (!%p1618_p2), %s1505_s24, 4294967168  ;;  %p13_p3 = scmp.ge.s32.totalorder %s1885_s18, 4   ;;  %s3226_s12 = smov %s1775_s13 }
 0x2f2   : > { %s3227_s13 = smov %s1779_s14  ;;  %s3228_s14 = smov %s1896_s21 }
 0x2f3   : > { %s3229_s15 = smov %s1885_s18  ;;  %15 = sbr.rel (!%p13_p3) target bundleno = 3 (0x3), region = 116 }
 0x2fa   :  { %1510 = vsyncpa [#allocation4], 1 }
 0x2fb   :  { %1512 = vsyncpa [#allocation4 + $0x1], 1 }

</bundles_post_ra>
